<compile_context>
chip_gen: v6e
topology: v6e:2x2x1
jax: 0.10.0
libtpu: 0.0.40
codegen_flags: <defaults>
</compile_context>

<pallas_src>
import functools

import jax
import jax.numpy as jnp
from jax.experimental import pallas as pl
from jax.experimental.pallas import tpu as pltpu


EPS = 1e-8
LANE = 128   # lane-dense padded width for the narrow (16/20-wide) tail matmul
BIG = 3.0e38  # additive exclusion constant (finite, so 0*BIG stays 0, no NaNs)


def _round_up(n, m):
    return ((n + m - 1) // m) * m


def _choose_tile(batch, tm_max=1024):
    """Pick (tm, b_pad): sublane-aligned tile with minimal padding, and an even
    number of balanced grid steps (>= 2) so both v7x TensorCores get work.
    tm is capped at tm_max to keep VMEM well below scoped defaults."""
    rows = _round_up(batch, 8)
    if rows <= 16:
        # Tiny batch: splitting would only add padding / step overhead.
        return rows, rows
    n_steps = max(2, -(-rows // tm_max))
    if n_steps % 2:
        n_steps += 1          # even step count -> balanced 2-core sharding on v7x
    tm = _round_up(-(-batch // n_steps), 8)
    return tm, n_steps * tm


def bounded_mlp_kernel(
    x_ref,
    w1_ref, b1_ref,
    w2_ref, b2_ref,
    w3_ref, b3_ref,
    w45_ref, b45_ref,
    sel1_ref, sel2_ref,
    scale_ref, lb_ref,
    o_ref,
    *, out_dim,
):
    f32 = jnp.float32
    bf16 = jnp.bfloat16

    # --- TrainableMLP: 3x (Linear + ReLU); bf16 MXU operands, f32 accumulate ---
    h = jnp.dot(x_ref[...], w1_ref[...], preferred_element_type=f32) + b1_ref[...]
    h = jnp.maximum(h, 0.0)
    h = jnp.dot(h.astype(bf16), w2_ref[...], preferred_element_type=f32) + b2_ref[...]
    h = jnp.maximum(h, 0.0)
    h = jnp.dot(h.astype(bf16), w3_ref[...], preferred_element_type=f32) + b3_ref[...]
    h = jnp.maximum(h, 0.0)

    # --- fused (Linear 64->20 ; Linear 20->16), zero-padded to 128 lanes ---
    scaled = (
        jnp.dot(h.astype(bf16), w45_ref[...], preferred_element_type=f32)
        + b45_ref[...]
    )

    # --- split min-max normalisation via precomputed lane selectors ---
    # sel1 = 1.0 on lanes [0, half), sel2 = 1.0 on lanes [half, out_dim).
    # Padded lanes (>= out_dim) are excluded from BOTH groups so their exact-0
    # values never pollute the group min/max.
    sel1 = sel1_ref[...]                       # (1, LANE) f32
    sel2 = sel2_ref[...]                       # (1, LANE) f32
    excl1 = (1.0 - sel1) * BIG                 # (1, LANE) — negligible work
    excl2 = (1.0 - sel2) * BIG
    nsel1 = 1.0 - sel1

    mn1 = jnp.min(scaled + excl1, axis=-1, keepdims=True)   # (tm, 1)
    mx1 = jnp.max(scaled - excl1, axis=-1, keepdims=True)
    mn2 = jnp.min(scaled + excl2, axis=-1, keepdims=True)
    mx2 = jnp.max(scaled - excl2, axis=-1, keepdims=True)

    mn = sel1 * mn1 + nsel1 * mn2              # per-lane group selection (mul-add)
    mx = sel1 * mx1 + nsel1 * mx2

    inv = pl.reciprocal(mx - mn + EPS, approx=True)   # EUP slot
    norm = (scaled - mn) * inv

    # --- affine rescale into [lower, upper]; store only the real out_dim lanes
    res = scale_ref[...] * norm + lb_ref[...]
    o_ref[...] = res[:, :out_dim].astype(o_ref.dtype)


def bounded_mlp_forward(x, params, lower_bound, upper_bound, *, tm_max=1024):
    """params: dict with keys w1..w5 (in,out layout) and b1..b5 (1,out), f32."""
    batch, in_dim = x.shape
    out_dim = params["w5"].shape[1]
    assert out_dim <= LANE
    half = (out_dim + 1) // 2  # torch.chunk: first chunk gets the ceil

    f32 = jnp.float32
    bf16 = jnp.bfloat16

    # Fuse the two final linears (exact in f32: no nonlinearity between them).
    w45 = params["w4"].astype(f32) @ params["w5"].astype(f32)                 # (64, out)
    b45 = params["b4"].astype(f32) @ params["w5"].astype(f32) + params["b5"]  # (1, out)

    # Zero-pad the fused layer / bounds out to a lane-dense 128-wide slab.
    w45_p = jnp.zeros((w45.shape[0], LANE), f32).at[:, :out_dim].set(w45).astype(bf16)
    b45_p = jnp.zeros((1, LANE), f32).at[:, :out_dim].set(b45)
    lb_p = jnp.zeros((1, LANE), f32).at[:, :out_dim].set(lower_bound.astype(f32))
    ub_p = jnp.zeros((1, LANE), f32).at[:, :out_dim].set(upper_bound.astype(f32))
    scale_p = ub_p - lb_p

    # Precomputed lane selectors for the split min-max normalisation.
    lane = jnp.arange(LANE)
    sel1 = (lane < half).astype(f32).reshape(1, LANE)
    sel2 = jnp.logical_and(lane >= half, lane < out_dim).astype(f32).reshape(1, LANE)

    # bf16 matmul operands; biases stay f32 for the elementwise path.
    w1 = params["w1"].astype(bf16); b1 = params["b1"].astype(f32)
    w2 = params["w2"].astype(bf16); b2 = params["b2"].astype(f32)
    w3 = params["w3"].astype(bf16); b3 = params["b3"].astype(f32)

    # Adaptive, balanced batch tiling (minimal padding; even number of steps).
    tm, b_pad = _choose_tile(batch, tm_max)
    x_p = jnp.zeros((b_pad, in_dim), bf16).at[:batch].set(x.astype(bf16))
    grid = (b_pad // tm,)

    def const_spec(a):
        # Full array as one block, same block every grid step -> stays resident.
        return pl.BlockSpec(a.shape, lambda i: (0,) * a.ndim)

    weights = (w1, b1, w2, b2, w3, b3, w45_p, b45_p, sel1, sel2, scale_p, lb_p)

    l1, l2, l3 = w1.shape[1], w2.shape[1], w3.shape[1]
    flops = 2 * b_pad * (in_dim * l1 + l1 * l2 + l2 * l3 + l3 * LANE)
    bytes_accessed = (
        sum(int(a.size) * a.dtype.itemsize for a in weights)
        + int(x_p.size) * x_p.dtype.itemsize
        + b_pad * out_dim * 4
    )

    out = pl.pallas_call(
        functools.partial(bounded_mlp_kernel, out_dim=out_dim),
        out_shape=jax.ShapeDtypeStruct((b_pad, out_dim), f32),
        grid=grid,
        in_specs=[pl.BlockSpec((tm, in_dim), lambda i: (i, 0))]
        + [const_spec(a) for a in weights],
        out_specs=pl.BlockSpec((tm, out_dim), lambda i: (i, 0)),
        compiler_params=pltpu.CompilerParams(
            # Working set at tm<=1024 is ~3-4 MB -> default scoped VMEM is fine
            # on v5e/v6e/v7x; only raise vmem_limit_bytes if tm_max is pushed
            # past ~2048.
            dimension_semantics=("parallel",),
        ),
        cost_estimate=pl.CostEstimate(
            flops=flops,
            transcendentals=b_pad * LANE,
            bytes_accessed=bytes_accessed,
        ),
    )(x_p, *weights)

    # Slice the real rows back out (output is already out_dim-wide).
    return out[:batch]


def init_linear(key, in_features, out_features):
    """Deterministic PyTorch-style init; weight returned as (in, out)."""
    kw, kb = jax.random.split(key)
    bound = 1.0 / jnp.sqrt(jnp.float32(in_features))
    w = jax.random.uniform(
        kw, (in_features, out_features), jnp.float32, minval=-bound, maxval=bound
    )
    b = jax.random.uniform(
        kb, (1, out_features), jnp.float32, minval=-bound, maxval=bound
    )
    return w, b


if __name__ == "__main__":
    # Small, module-consistent shapes.
    n_wavelengths = 16
    in_dim = 2 * n_wavelengths          # 32
    l1, l2, l3 = 128, 512, 64
    pretreated_size = 20                # TrainableMLP.output_size
    output_size = 16                    # BoundedMLP output_size (even -> clean halves)
    batch = 300                         # -> tm=152, grid=(2,), only 4 padded rows

    key = jax.random.PRNGKey(0)
    keys = jax.random.split(key, 6)

    w1, b1 = init_linear(keys[0], in_dim, l1)
    w2, b2 = init_linear(keys[1], l1, l2)
    w3, b3 = init_linear(keys[2], l2, l3)
    w4, b4 = init_linear(keys[3], l3, pretreated_size)
    w5, b5 = init_linear(keys[4], pretreated_size, output_size)

    params = dict(
        w1=w1, b1=b1, w2=w2, b2=b2, w3=w3, b3=b3, w4=w4, b4=b4, w5=w5, b5=b5
    )

    # Default bounds from the module: zeros / ones of shape (1, output_size).
    lower_bound = jnp.zeros((1, output_size), jnp.float32)
    upper_bound = jnp.ones((1, output_size), jnp.float32)

    x = jax.random.normal(keys[5], (batch, in_dim), jnp.float32)

    out = bounded_mlp_forward(x, params, lower_bound, upper_bound)
    out = jax.block_until_ready(out)
    assert out.shape == (batch, output_size)

    half = (output_size + 1) // 2

    def _mm(t):
        mn = jnp.min(t, axis=-1, keepdims=True)
        mx = jnp.max(t, axis=-1, keepdims=True)
        return (t - mn) / (mx - mn + EPS)

    # Reference 1: same numeric path as the kernel (bf16 MXU operands, fused
    # last layers) but with exact division -- tight tolerance check.
    def ref_forward_bf16(xv):
        bf16 = jnp.bfloat16

        def bdot(a, b):
            return jnp.dot(a.astype(bf16), b.astype(bf16),
                           preferred_element_type=jnp.float32)

        h = jnp.maximum(bdot(xv, w1) + b1, 0.0)
        h = jnp.maximum(bdot(h, w2) + b2, 0.0)
        h = jnp.maximum(bdot(h, w3) + b3, 0.0)
        w45 = w4 @ w5
        b45 = b4 @ w5 + b5
        s = bdot(h, w45) + b45
        norm = jnp.concatenate([_mm(s[:, :half]), _mm(s[:, half:])], axis=-1)
        return (upper_bound - lower_bound) * norm + lower_bound

    # Reference 2: original module semantics in full f32 -- loose sanity check
    # for the bf16 matmul approximation.
    def ref_forward_f32(xv):
        h = jnp.maximum(xv @ w1 + b1, 0.0)
        h = jnp.maximum(h @ w2 + b2, 0.0)
        h = jnp.maximum(h @ w3 + b3, 0.0)
        p = h @ w4 + b4
        s = p @ w5 + b5
        norm = jnp.concatenate([_mm(s[:, :half]), _mm(s[:, half:])], axis=-1)
        return (upper_bound - lower_bound) * norm + lower_bound

    ref_bf16 = ref_forward_bf16(x)
    ref_f32 = ref_forward_f32(x)

    assert jnp.allclose(out, ref_bf16, atol=1e-2, rtol=1e-2)
    assert float(jnp.max(jnp.abs(out - ref_f32))) < 0.1

    print("KERNEL_OK")
</pallas_src>

<mosaic_0001>
module attributes {stable_mosaic.version = 11 : i64} {
  func.func @bounded_mlp_kernel(%arg0: i32, %arg1: memref<152x32xbf16, #tpu.memory_space<vmem>>, %arg2: memref<32x128xbf16, #tpu.memory_space<vmem>>, %arg3: memref<1x128xf32, #tpu.memory_space<vmem>>, %arg4: memref<128x512xbf16, #tpu.memory_space<vmem>>, %arg5: memref<1x512xf32, #tpu.memory_space<vmem>>, %arg6: memref<512x64xbf16, #tpu.memory_space<vmem>>, %arg7: memref<1x64xf32, #tpu.memory_space<vmem>>, %arg8: memref<64x128xbf16, #tpu.memory_space<vmem>>, %arg9: memref<1x128xf32, #tpu.memory_space<vmem>>, %arg10: memref<1x128xf32, #tpu.memory_space<vmem>>, %arg11: memref<1x128xf32, #tpu.memory_space<vmem>>, %arg12: memref<1x128xf32, #tpu.memory_space<vmem>>, %arg13: memref<1x128xf32, #tpu.memory_space<vmem>>, %arg14: memref<152x16xf32, #tpu.memory_space<vmem>>) attributes {dimension_semantics = [#tpu.dimension_semantics<parallel>], iteration_bounds = array<i64: 2>, scalar_prefetch = 0 : i64, scratch_operands = 0 : i64, tpu.core_type = #tpu.core_type<tc>, window_params = [{transform_indices = @transform_0, window_bounds = array<i64: 152, 32>}, {pipeline_mode = #tpu.pipeline_mode<synchronous>, transform_indices = @transform_1, window_bounds = array<i64: 32, 128>}, {pipeline_mode = #tpu.pipeline_mode<synchronous>, transform_indices = @transform_2, window_bounds = array<i64: 1, 128>}, {pipeline_mode = #tpu.pipeline_mode<synchronous>, transform_indices = @transform_3, window_bounds = array<i64: 128, 512>}, {pipeline_mode = #tpu.pipeline_mode<synchronous>, transform_indices = @transform_4, window_bounds = array<i64: 1, 512>}, {pipeline_mode = #tpu.pipeline_mode<synchronous>, transform_indices = @transform_5, window_bounds = array<i64: 512, 64>}, {pipeline_mode = #tpu.pipeline_mode<synchronous>, transform_indices = @transform_6, window_bounds = array<i64: 1, 64>}, {pipeline_mode = #tpu.pipeline_mode<synchronous>, transform_indices = @transform_7, window_bounds = array<i64: 64, 128>}, {pipeline_mode = #tpu.pipeline_mode<synchronous>, transform_indices = @transform_8, window_bounds = array<i64: 1, 128>}, {pipeline_mode = #tpu.pipeline_mode<synchronous>, transform_indices = @transform_9, window_bounds = array<i64: 1, 128>}, {pipeline_mode = #tpu.pipeline_mode<synchronous>, transform_indices = @transform_10, window_bounds = array<i64: 1, 128>}, {pipeline_mode = #tpu.pipeline_mode<synchronous>, transform_indices = @transform_11, window_bounds = array<i64: 1, 128>}, {pipeline_mode = #tpu.pipeline_mode<synchronous>, transform_indices = @transform_12, window_bounds = array<i64: 1, 128>}, {transform_indices = @transform_13, window_bounds = array<i64: 152, 16>}]} {
    %c0 = arith.constant 0 : index
    %c0_0 = arith.constant 0 : index
    %0 = vector.load %arg1[%c0, %c0_0] : memref<152x32xbf16, #tpu.memory_space<vmem>>, vector<152x32xbf16>
    %c0_1 = arith.constant 0 : index
    %c0_2 = arith.constant 0 : index
    %1 = vector.load %arg2[%c0_1, %c0_2] : memref<32x128xbf16, #tpu.memory_space<vmem>>, vector<32x128xbf16>
    %cst = arith.constant dense<0.000000e+00> : vector<152x128xf32>
    %2 = tpu.matmul %0, %1, %cst {dimension_numbers = #tpu.dot_dimension_numbers<[1], [0], [0], [1], [0, 0, 1, 1], [], []>} : vector<152x32xbf16>, vector<32x128xbf16>, vector<152x128xf32> -> vector<152x128xf32>
    %c0_3 = arith.constant 0 : index
    %c0_4 = arith.constant 0 : index
    %3 = vector.load %arg3[%c0_3, %c0_4] : memref<1x128xf32, #tpu.memory_space<vmem>>, vector<1x128xf32>
    %4 = vector.broadcast %3 : vector<1x128xf32> to vector<152x128xf32>
    %5 = arith.addf %2, %4 : vector<152x128xf32>
    %cst_5 = arith.constant 0.000000e+00 : f32
    %6 = vector.broadcast %cst_5 : f32 to vector<152x128xf32>
    %7 = arith.maximumf %5, %6 : vector<152x128xf32>
    %8 = arith.truncf %7 : vector<152x128xf32> to vector<152x128xbf16>
    %c0_6 = arith.constant 0 : index
    %c0_7 = arith.constant 0 : index
    %9 = vector.load %arg4[%c0_6, %c0_7] : memref<128x512xbf16, #tpu.memory_space<vmem>>, vector<128x512xbf16>
    %cst_8 = arith.constant dense<0.000000e+00> : vector<152x512xf32>
    %10 = tpu.matmul %8, %9, %cst_8 {dimension_numbers = #tpu.dot_dimension_numbers<[1], [0], [0], [1], [0, 0, 1, 1], [], []>} : vector<152x128xbf16>, vector<128x512xbf16>, vector<152x512xf32> -> vector<152x512xf32>
    %c0_9 = arith.constant 0 : index
    %c0_10 = arith.constant 0 : index
    %11 = vector.load %arg5[%c0_9, %c0_10] : memref<1x512xf32, #tpu.memory_space<vmem>>, vector<1x512xf32>
    %12 = vector.broadcast %11 : vector<1x512xf32> to vector<152x512xf32>
    %13 = arith.addf %10, %12 : vector<152x512xf32>
    %cst_11 = arith.constant 0.000000e+00 : f32
    %14 = vector.broadcast %cst_11 : f32 to vector<152x512xf32>
    %15 = arith.maximumf %13, %14 : vector<152x512xf32>
    %16 = arith.truncf %15 : vector<152x512xf32> to vector<152x512xbf16>
    %c0_12 = arith.constant 0 : index
    %c0_13 = arith.constant 0 : index
    %17 = vector.load %arg6[%c0_12, %c0_13] : memref<512x64xbf16, #tpu.memory_space<vmem>>, vector<512x64xbf16>
    %cst_14 = arith.constant dense<0.000000e+00> : vector<152x64xf32>
    %18 = tpu.matmul %16, %17, %cst_14 {dimension_numbers = #tpu.dot_dimension_numbers<[1], [0], [0], [1], [0, 0, 1, 1], [], []>} : vector<152x512xbf16>, vector<512x64xbf16>, vector<152x64xf32> -> vector<152x64xf32>
    %c0_15 = arith.constant 0 : index
    %c0_16 = arith.constant 0 : index
    %19 = vector.load %arg7[%c0_15, %c0_16] : memref<1x64xf32, #tpu.memory_space<vmem>>, vector<1x64xf32>
    %20 = vector.broadcast %19 : vector<1x64xf32> to vector<152x64xf32>
    %21 = arith.addf %18, %20 : vector<152x64xf32>
    %cst_17 = arith.constant 0.000000e+00 : f32
    %22 = vector.broadcast %cst_17 : f32 to vector<152x64xf32>
    %23 = arith.maximumf %21, %22 : vector<152x64xf32>
    %24 = arith.truncf %23 : vector<152x64xf32> to vector<152x64xbf16>
    %c0_18 = arith.constant 0 : index
    %c0_19 = arith.constant 0 : index
    %25 = vector.load %arg8[%c0_18, %c0_19] : memref<64x128xbf16, #tpu.memory_space<vmem>>, vector<64x128xbf16>
    %cst_20 = arith.constant dense<0.000000e+00> : vector<152x128xf32>
    %26 = tpu.matmul %24, %25, %cst_20 {dimension_numbers = #tpu.dot_dimension_numbers<[1], [0], [0], [1], [0, 0, 1, 1], [], []>} : vector<152x64xbf16>, vector<64x128xbf16>, vector<152x128xf32> -> vector<152x128xf32>
    %c0_21 = arith.constant 0 : index
    %c0_22 = arith.constant 0 : index
    %27 = vector.load %arg9[%c0_21, %c0_22] : memref<1x128xf32, #tpu.memory_space<vmem>>, vector<1x128xf32>
    %28 = vector.broadcast %27 : vector<1x128xf32> to vector<152x128xf32>
    %29 = arith.addf %26, %28 : vector<152x128xf32>
    %c0_23 = arith.constant 0 : index
    %c0_24 = arith.constant 0 : index
    %30 = vector.load %arg10[%c0_23, %c0_24] : memref<1x128xf32, #tpu.memory_space<vmem>>, vector<1x128xf32>
    %c0_25 = arith.constant 0 : index
    %c0_26 = arith.constant 0 : index
    %31 = vector.load %arg11[%c0_25, %c0_26] : memref<1x128xf32, #tpu.memory_space<vmem>>, vector<1x128xf32>
    %cst_27 = arith.constant 1.000000e+00 : f32
    %32 = vector.broadcast %cst_27 : f32 to vector<1x128xf32>
    %33 = arith.subf %32, %30 : vector<1x128xf32>
    %cst_28 = arith.constant 3.000000e+38 : f32
    %34 = vector.broadcast %cst_28 : f32 to vector<1x128xf32>
    %35 = arith.mulf %33, %34 : vector<1x128xf32>
    %cst_29 = arith.constant 1.000000e+00 : f32
    %36 = vector.broadcast %cst_29 : f32 to vector<1x128xf32>
    %37 = arith.subf %36, %31 : vector<1x128xf32>
    %cst_30 = arith.constant 3.000000e+38 : f32
    %38 = vector.broadcast %cst_30 : f32 to vector<1x128xf32>
    %39 = arith.mulf %37, %38 : vector<1x128xf32>
    %cst_31 = arith.constant 1.000000e+00 : f32
    %40 = vector.broadcast %cst_31 : f32 to vector<1x128xf32>
    %41 = arith.subf %40, %30 : vector<1x128xf32>
    %42 = vector.broadcast %35 : vector<1x128xf32> to vector<152x128xf32>
    %43 = arith.addf %29, %42 : vector<152x128xf32>
    %cst_32 = arith.constant dense<0x7F800000> : vector<152xf32>
    %44 = vector.multi_reduction <minimumf>, %43, %cst_32 [1] : vector<152x128xf32> to vector<152xf32>
    %45 = vector.shape_cast %44 : vector<152xf32> to vector<152x1xf32>
    %46 = vector.broadcast %35 : vector<1x128xf32> to vector<152x128xf32>
    %47 = arith.subf %29, %46 : vector<152x128xf32>
    %cst_33 = arith.constant dense<0xFF800000> : vector<152xf32>
    %48 = vector.multi_reduction <maximumf>, %47, %cst_33 [1] : vector<152x128xf32> to vector<152xf32>
    %49 = vector.shape_cast %48 : vector<152xf32> to vector<152x1xf32>
    %50 = vector.broadcast %39 : vector<1x128xf32> to vector<152x128xf32>
    %51 = arith.addf %29, %50 : vector<152x128xf32>
    %cst_34 = arith.constant dense<0x7F800000> : vector<152xf32>
    %52 = vector.multi_reduction <minimumf>, %51, %cst_34 [1] : vector<152x128xf32> to vector<152xf32>
    %53 = vector.shape_cast %52 : vector<152xf32> to vector<152x1xf32>
    %54 = vector.broadcast %39 : vector<1x128xf32> to vector<152x128xf32>
    %55 = arith.subf %29, %54 : vector<152x128xf32>
    %cst_35 = arith.constant dense<0xFF800000> : vector<152xf32>
    %56 = vector.multi_reduction <maximumf>, %55, %cst_35 [1] : vector<152x128xf32> to vector<152xf32>
    %57 = vector.shape_cast %56 : vector<152xf32> to vector<152x1xf32>
    %58 = vector.broadcast %30 : vector<1x128xf32> to vector<152x128xf32>
    %59 = vector.broadcast %45 : vector<152x1xf32> to vector<152x128xf32>
    %60 = arith.mulf %58, %59 : vector<152x128xf32>
    %61 = vector.broadcast %41 : vector<1x128xf32> to vector<152x128xf32>
    %62 = vector.broadcast %53 : vector<152x1xf32> to vector<152x128xf32>
    %63 = arith.mulf %61, %62 : vector<152x128xf32>
    %64 = arith.addf %60, %63 : vector<152x128xf32>
    %65 = vector.broadcast %30 : vector<1x128xf32> to vector<152x128xf32>
    %66 = vector.broadcast %49 : vector<152x1xf32> to vector<152x128xf32>
    %67 = arith.mulf %65, %66 : vector<152x128xf32>
    %68 = vector.broadcast %41 : vector<1x128xf32> to vector<152x128xf32>
    %69 = vector.broadcast %57 : vector<152x1xf32> to vector<152x128xf32>
    %70 = arith.mulf %68, %69 : vector<152x128xf32>
    %71 = arith.addf %67, %70 : vector<152x128xf32>
    %72 = arith.subf %71, %64 : vector<152x128xf32>
    %cst_36 = arith.constant 9.99999993E-9 : f32
    %73 = vector.broadcast %cst_36 : f32 to vector<152x128xf32>
    %74 = arith.addf %72, %73 : vector<152x128xf32>
    %75 = tpu.reciprocal %74 {approx = true} : vector<152x128xf32> -> vector<152x128xf32>
    %76 = arith.subf %29, %64 : vector<152x128xf32>
    %77 = arith.mulf %76, %75 : vector<152x128xf32>
    %c0_37 = arith.constant 0 : index
    %c0_38 = arith.constant 0 : index
    %78 = vector.load %arg12[%c0_37, %c0_38] : memref<1x128xf32, #tpu.memory_space<vmem>>, vector<1x128xf32>
    %79 = vector.broadcast %78 : vector<1x128xf32> to vector<152x128xf32>
    %80 = arith.mulf %79, %77 : vector<152x128xf32>
    %c0_39 = arith.constant 0 : index
    %c0_40 = arith.constant 0 : index
    %81 = vector.load %arg13[%c0_39, %c0_40] : memref<1x128xf32, #tpu.memory_space<vmem>>, vector<1x128xf32>
    %82 = vector.broadcast %81 : vector<1x128xf32> to vector<152x128xf32>
    %83 = arith.addf %80, %82 : vector<152x128xf32>
    %84 = vector.extract_strided_slice %83 {offsets = [0, 0], sizes = [152, 16], strides = [1, 1]} : vector<152x128xf32> to vector<152x16xf32>
    %c0_41 = arith.constant 0 : index
    %c0_42 = arith.constant 0 : index
    %85 = vector.load %arg14[%c0_41, %c0_42] : memref<152x16xf32, #tpu.memory_space<vmem>>, vector<152x16xf32>
    tpu.vector_store %arg14[%c0_41, %c0_42], %84 {strides = array<i32>} : memref<152x16xf32, #tpu.memory_space<vmem>>, vector<152x16xf32>,
    return
  }
  func.func @transform_0(%arg0: i32) -> (i32, i32) {
    %c0_i32 = arith.constant 0 : i32
    %c0_i32_0 = arith.constant 0 : i32
    return %arg0, %c0_i32 : i32, i32
  }
  func.func @transform_1(%arg0: i32) -> (i32, i32) {
    %c0_i32 = arith.constant 0 : i32
    %c0_i32_0 = arith.constant 0 : i32
    %c0_i32_1 = arith.constant 0 : i32
    return %c0_i32, %c0_i32_0 : i32, i32
  }
  func.func @transform_2(%arg0: i32) -> (i32, i32) {
    %c0_i32 = arith.constant 0 : i32
    %c0_i32_0 = arith.constant 0 : i32
    %c0_i32_1 = arith.constant 0 : i32
    return %c0_i32, %c0_i32_0 : i32, i32
  }
  func.func @transform_3(%arg0: i32) -> (i32, i32) {
    %c0_i32 = arith.constant 0 : i32
    %c0_i32_0 = arith.constant 0 : i32
    %c0_i32_1 = arith.constant 0 : i32
    return %c0_i32, %c0_i32_0 : i32, i32
  }
  func.func @transform_4(%arg0: i32) -> (i32, i32) {
    %c0_i32 = arith.constant 0 : i32
    %c0_i32_0 = arith.constant 0 : i32
    %c0_i32_1 = arith.constant 0 : i32
    return %c0_i32, %c0_i32_0 : i32, i32
  }
  func.func @transform_5(%arg0: i32) -> (i32, i32) {
    %c0_i32 = arith.constant 0 : i32
    %c0_i32_0 = arith.constant 0 : i32
    %c0_i32_1 = arith.constant 0 : i32
    return %c0_i32, %c0_i32_0 : i32, i32
  }
  func.func @transform_6(%arg0: i32) -> (i32, i32) {
    %c0_i32 = arith.constant 0 : i32
    %c0_i32_0 = arith.constant 0 : i32
    %c0_i32_1 = arith.constant 0 : i32
    return %c0_i32, %c0_i32_0 : i32, i32
  }
  func.func @transform_7(%arg0: i32) -> (i32, i32) {
    %c0_i32 = arith.constant 0 : i32
    %c0_i32_0 = arith.constant 0 : i32
    %c0_i32_1 = arith.constant 0 : i32
    return %c0_i32, %c0_i32_0 : i32, i32
  }
  func.func @transform_8(%arg0: i32) -> (i32, i32) {
    %c0_i32 = arith.constant 0 : i32
    %c0_i32_0 = arith.constant 0 : i32
    %c0_i32_1 = arith.constant 0 : i32
    return %c0_i32, %c0_i32_0 : i32, i32
  }
  func.func @transform_9(%arg0: i32) -> (i32, i32) {
    %c0_i32 = arith.constant 0 : i32
    %c0_i32_0 = arith.constant 0 : i32
    %c0_i32_1 = arith.constant 0 : i32
    return %c0_i32, %c0_i32_0 : i32, i32
  }
  func.func @transform_10(%arg0: i32) -> (i32, i32) {
    %c0_i32 = arith.constant 0 : i32
    %c0_i32_0 = arith.constant 0 : i32
    %c0_i32_1 = arith.constant 0 : i32
    return %c0_i32, %c0_i32_0 : i32, i32
  }
  func.func @transform_11(%arg0: i32) -> (i32, i32) {
    %c0_i32 = arith.constant 0 : i32
    %c0_i32_0 = arith.constant 0 : i32
    %c0_i32_1 = arith.constant 0 : i32
    return %c0_i32, %c0_i32_0 : i32, i32
  }
  func.func @transform_12(%arg0: i32) -> (i32, i32) {
    %c0_i32 = arith.constant 0 : i32
    %c0_i32_0 = arith.constant 0 : i32
    %c0_i32_1 = arith.constant 0 : i32
    return %c0_i32, %c0_i32_0 : i32, i32
  }
  func.func @transform_13(%arg0: i32) -> (i32, i32) {
    %c0_i32 = arith.constant 0 : i32
    %c0_i32_0 = arith.constant 0 : i32
    return %arg0, %c0_i32 : i32, i32
  }
}

</mosaic_0001>

<bundles_post_ra>
// kernel: tpu_custom_call.1
= control target key start
LH: loop header
LB: loop body
LE: loop exit
PB: predicated region body
PF: predicated region fallthrough
CT: control target
= control target key end

     0   :  { %s3166_s25 = smov 0   ;;  %s4040_s0 = inlined_call_operand.vmem [shape: bf16[304,32], index: 0, kind: input, shape index: {}]   ;;  %s4041_s1 = inlined_call_operand.vmem [shape: bf16[32,128], index: 1, kind: input, shape index: {}]   ;;  %s4042_s2 = inlined_call_operand.vmem [shape: f32[1,128], index: 2, kind: input, shape index: {}]   ;;  %s4043_s3 = inlined_call_operand.vmem [shape: bf16[128,512], index: 3, kind: input, shape index: {}]   ;;  %s4044_s4 = inlined_call_operand.vmem [shape: f32[1,512], index: 4, kind: input, shape index: {}]   ;;  %s4045_s5 = inlined_call_operand.vmem [shape: bf16[512,64], index: 5, kind: input, shape index: {}]   ;;  %s4046_s6 = inlined_call_operand.vmem [shape: f32[1,64], index: 6, kind: input, shape index: {}]   ;;  %s4047_s7 = inlined_call_operand.vmem [shape: bf16[64,128], index: 7, kind: input, shape index: {}]   ;;  %s4048_s8 = inlined_call_operand.vmem [shape: f32[1,128], index: 8, kind: input, shape index: {}]   ;;  %s4049_s9 = inlined_call_operand.vmem [shape: f32[1,128], index: 9, kind: input, shape index: {}]   ;;  %s4050_s10 = inlined_call_operand.vmem [shape: f32[1,128], index: 10, kind: input, shape index: {}]   ;;  %s4051_s11 = inlined_call_operand.vmem [shape: f32[1,128], index: 11, kind: input, shape index: {}]   ;;  %s4052_s12 = inlined_call_operand.vmem [shape: f32[1,128], index: 12, kind: input, shape index: {}]   ;;  %s4053_s13 = inlined_call_operand.vmem [shape: f32[304,16], index: 13, kind: output, shape index: {}]  }
   0x1 LB: > { %s2592_s26 = sadd.s32 4294967295, %s3093_s25   ;;  %p2596_p0 = scmp.ge.s32.totalorder %s3093_s25, 1  ;;  %s3093_s25 = sphi %s3166_s25, %s23_s25  }
   0x2   : > { %p388_p1 = scmp.lt.s32.totalorder %s3093_s25, 3 }
   0x4   : > { %p389_p2 = pnand %p2596_p0, %p388_p1 }
   0x5   : > { %s432_s29 = smul.u32 (!%p389_p2), 19, %s2592_s26 }
   0x6   : > { %392 = sbr.rel (%p389_p2) target bundleno = 1161 (0x489), region = 72 }
   0x7   : > { %p433_p3 = scmp.lt.s32.totalorder (!%p389_p2), %s432_s29, 37 }
   0xb   : > { %v2953_v0 = vld [vmem:[%s4041_s1 + $0x8] sm:$0xff]   ;;  %v2954_v1 = vld [vmem:[%s4041_s1] sm:$0xff]   ;;  %s4055_s29 = smov (!%p433_p3, %s432_s29), 37  ;;  %vm535_vm0 = vcmask 261120   ;;  %v3095_v44 = vmov 0   ;;  %v3013_v45 = vld [vmem:[%s4045_s5 + $0x78] sm:$0xff]  }
   0xc   : > { %2884 = vmatprep.subr.bf16.mxu0 %v2953_v0  ;;  %v2967_v2 = vld [vmem:[%s4043_s3 + $0xec] ss:$16 sps:$4 sm:$0xff]   ;;  %v2971_v3 = vld [vmem:[%s4043_s3 + $0xe4] ss:$16 sps:$4 sm:$0xff]   ;;  %v2973_v4 = vld [vmem:[%s4043_s3 + $0xe0] ss:$16 sps:$4 sm:$0xff]   ;;  %953 = vmatprep.mubr.bf16.mxu1 %v3095_v44 }
   0xd   : > { %2885 = vmatpush3.bf16.msra.mxu0 %v2953_v0  ;;  %s2597_s21 = sshll.u32 %s4055_s29, 2  ;;  %v2965_v5 = vld [vmem:[%s4043_s3 + $0xe8] ss:$16 sps:$4 sm:$0xff]   ;;  %v2970_v6 = vld [vmem:[%s4043_s3 + $0xcc] ss:$16 sps:$4 sm:$0xff]   ;;  %921 = vmatprep.subr.bf16.mxu1 %v2971_v3  ;;  %v3017_v63 = vld [vmem:[%s4045_s5 + $0x70] sm:$0xff]  }
   0xe   : > { %2886 = vmatprep.subr.bf16.mxu0 %v2954_v1  ;;  %s3198_s27 = scalar_lea.vmem %s4040_s0, %s2597_s21  ;;  %922 = vmatpush1.bf16.msra.mxu1 %v2973_v4  ;;  %v2968_v10 = vld [vmem:[%s4043_s3 + $0xc8] ss:$16 sps:$4 sm:$0xff]   ;;  %v2976_v11 = vld [vmem:[%s4043_s3 + $0xac] ss:$16 sps:$4 sm:$0xff]   ;;  %v2977_v15 = vld [vmem:[%s4043_s3 + $0xc4] ss:$16 sps:$4 sm:$0xff]  }
   0xf   : > { %v2955_v7 = vld [vmem:[%s3198_s27] sm:$0xff]   ;;  %v2956_v8 = vld [vmem:[%s3198_s27 + $0x8] sm:$0xff]   ;;  %v2957_v9 = vld [vmem:[%s3198_s27 + $0x10] sm:$0xff]   ;;  %923 = vmatprep.subr.bf16.mxu1 %v2977_v15  ;;  %vm1854_vm1 = vcmask 523264   ;;  %s2598_s21 = sshll.u32 %s4055_s29, 3  ;;  %vm2516_vm2 = vcmask 130048  }
  0x10   : > { %2888 = vmatprep.mubr.msk.bf16.mxu0 %vm535_vm0, %v2955_v7  ;;  %v2974_v12 = vld [vmem:[%s4043_s3 + $0xa8] ss:$16 sps:$4 sm:$0xff]   ;;  %v2959_v14 = vld [vmem:[%s3198_s27 + $0x20] sm:$0xff]   ;;  %v2984_v19 = vld [vmem:[%s4043_s3 + $0x8c] ss:$16 sps:$4 sm:$0xff]   ;;  %s3882_s28 = scalar_lea.vmem %s4053_s13, %s2598_s21 }
  0x11   : > { %2887 = vmatpush3.bf16.msra.mxu0 %v2954_v1  ;;  %v2958_v13 = vld [vmem:[%s3198_s27 + $0x18] sm:$0xff]   ;;  %v2979_v16 = vld [vmem:[%s4043_s3 + $0xc0] ss:$16 sps:$4 sm:$0xff]   ;;  %v2980_v17 = vld [vmem:[%s4043_s3 + $0xa4] ss:$16 sps:$4 sm:$0xff]  }
  0x12   : > { %1052 = vmatprep.subr.bf16.mxu0 %v2967_v2  ;;  %v2982_v18 = vld [vmem:[%s4043_s3 + $0x88] ss:$16 sps:$4 sm:$0xff]   ;;  %924 = vmatpush1.bf16.msra.mxu1 %v2979_v16  ;;  %v2985_v21 = vld [vmem:[%s4043_s3 + $0xa0] ss:$16 sps:$4 sm:$0xff]   ;;  %v2986_v22 = vld [vmem:[%s4043_s3 + $0x84] ss:$16 sps:$4 sm:$0xff]  }
  0x13   : > { %v2960_v20 = vld [vmem:[%s3198_s27 + $0x28] sm:$0xff]   ;;  %925 = vmatprep.subr.bf16.mxu1 %v2980_v17  ;;  %v2961_v23 = vld [vmem:[%s3198_s27 + $0x30] sm:$0xff]   ;;  %v2962_v31 = vld [vmem:[%s3198_s27 + $0x38] sm:$0xff]  }
  0x14   : > { %2889 = vmatmul.mubr.msk.bf16.vlgmr.msra.gmra.mxu0 %vm535_vm0, %v2956_v8  ;;  %v2991_v24 = vld [vmem:[%s4043_s3 + $0x6c] ss:$16 sps:$4 sm:$0xff]   ;;  %v2988_v25 = vld [vmem:[%s4043_s3 + $0x80] ss:$16 sps:$4 sm:$0xff]   ;;  %v2989_v26 = vld [vmem:[%s4043_s3 + $0x68] ss:$16 sps:$4 sm:$0xff]  }
  0x15   : > { %2892 = vmatprep.mubr.msk.bf16.mxu0 %vm535_vm0, %v2957_v9  ;;  %1053 = vmatpush1.bf16.msra.mxu0 %v2965_v5  ;;  %v2992_v27 = vld [vmem:[%s4043_s3 + $0x64] ss:$16 sps:$4 sm:$0xff]   ;;  %v2995_v28 = vld [vmem:[%s4043_s3 + $0x48] ss:$16 sps:$4 sm:$0xff]   ;;  %v2997_v29 = vld [vmem:[%s4043_s3 + $0x4c] ss:$16 sps:$4 sm:$0xff]  }
  0x16   : > { %1054 = vmatprep.subr.bf16.mxu0 %v2970_v6  ;;  %926 = vmatpush1.bf16.msra.mxu1 %v2985_v21  ;;  %v2994_v30 = vld [vmem:[%s4043_s3 + $0x60] ss:$16 sps:$4 sm:$0xff]   ;;  %v2964_v33 = vld [vmem:[%s3198_s27 + $0x48] ss:$0 sps:$4 sm:$0xff]   ;;  %v2998_v34 = vld [vmem:[%s4043_s3 + $0x44] ss:$16 sps:$4 sm:$0xff]  }
  0x17   : > { %927 = vmatprep.subr.bf16.mxu1 %v2986_v22  ;;  %v2963_v32 = vld [vmem:[%s3198_s27 + $0x40] sm:$0xff]   ;;  %v3003_v36 = vld [vmem:[%s4043_s3 + $0x2c] ss:$16 sps:$4 sm:$0xff]   ;;  %v3001_v38 = vld [vmem:[%s4043_s3 + $0x28] ss:$16 sps:$4 sm:$0xff]  }
  0x18   : > { %v3000_v35 = vld [vmem:[%s4043_s3 + $0x40] ss:$16 sps:$4 sm:$0xff]   ;;  %v3004_v37 = vld [vmem:[%s4043_s3 + $0x24] ss:$16 sps:$4 sm:$0xff]   ;;  %v3011_v41 = vld [vmem:[%s4043_s3 + $0xc] ss:$16 sps:$4 sm:$0xff]  }
  0x19   : > { %1055 = vmatpush1.bf16.msra.mxu0 %v2968_v10  ;;  %v3006_v39 = vld [vmem:[%s4043_s3 + $0x20] ss:$16 sps:$4 sm:$0xff]   ;;  %v3007_v40 = vld [vmem:[%s4043_s3 + $0x4] ss:$16 sps:$4 sm:$0xff]   ;;  %v3009_v42 = vld [vmem:[%s4043_s3 + $0x8] ss:$16 sps:$4 sm:$0xff]  }
  0x1a   : > { %1056 = vmatprep.subr.bf16.mxu0 %v2976_v11  ;;  %928 = vmatpush1.bf16.msra.mxu1 %v2988_v25  ;;  %v3012_v43 = vld [vmem:[%s4043_s3] ss:$16 sps:$4 sm:$0xff]   ;;  %v3015_v46 = vld [vmem:[%s4045_s5 + $0xf8] sm:$0xff]   ;;  %v3021_v7 = vld [vmem:[%s4045_s5 + $0x68] sm:$0xff]  }
  0x1b   : > { %929 = vmatprep.subr.bf16.mxu1 %v2992_v27  ;;  %v3315_v49 = vld [vmem:[%s4042_s2] ss:$0 sm:$0xff]  ;;  %v3014_v60 = vld [vmem:[%s4045_s5 + $0x38] sm:$0xff]   ;;  %v3019_v0 = vld [vmem:[%s4045_s5 + $0xf0] sm:$0xff]  }
  0x1c   : > { %2893 = vmatmul.mubr.msk.bf16.gmra.mxu0 %vm535_vm0, %v2958_v13  ;;  %v3016_v61 = vld [vmem:[%s4045_s5 + $0xb8] sm:$0xff]   ;;  %v3018_v4 = vld [vmem:[%s4045_s5 + $0x30] sm:$0xff]   ;;  %v3023_v8 = vld [vmem:[%s4045_s5 + $0xe8] sm:$0xff]  }
  0x1d   : > { %2896 = vmatprep.mubr.msk.bf16.mxu0 %vm535_vm0, %v2959_v14  ;;  %1057 = vmatpush1.bf16.msra.mxu0 %v2974_v12  ;;  %v3020_v5 = vld [vmem:[%s4045_s5 + $0xb0] sm:$0xff]   ;;  %v3022_v14 = vld [vmem:[%s4045_s5 + $0x28] sm:$0xff]   ;;  %v3025_v17 = vld [vmem:[%s4045_s5 + $0x60] sm:$0xff]  }
  0x1e   : > { %1058 = vmatprep.subr.bf16.mxu0 %v2984_v19  ;;  %930 = vmatpush1.bf16.msra.mxu1 %v2994_v30  ;;  %v3024_v15 = vld [vmem:[%s4045_s5 + $0xa8] sm:$0xff]   ;;  %v3026_v22 = vld [vmem:[%s4045_s5 + $0x20] sm:$0xff]   ;;  %v3029_v25 = vld [vmem:[%s4045_s5 + $0x58] sm:$0xff]  }
  0x1f   : > { %931 = vmatprep.subr.bf16.mxu1 %v2998_v34  ;;  %v3033_v34 = vld [vmem:[%s4045_s5 + $0x50] sm:$0xff]  }
  0x21   : > { %1059 = vmatpush1.bf16.msra.mxu0 %v2982_v18  ;;  %v3027_v18 = vld [vmem:[%s4045_s5 + $0xe0] sm:$0xff]  }
  0x22   : > { %1060 = vmatprep.subr.bf16.mxu0 %v2991_v24  ;;  %932 = vmatpush1.bf16.msra.mxu1 %v3000_v35  ;;  %v3035_v35 = vld [vmem:[%s4045_s5 + $0xd0] sm:$0xff]  }
  0x23   : > { %933 = vmatprep.subr.bf16.mxu1 %v3004_v37 }
  0x24   : > { %2897 = vmatmul.mubr.msk.bf16.gmra.mxu0 %vm535_vm0, %v2960_v20 }
  0x25   : > { %2900 = vmatprep.mubr.msk.bf16.mxu0 %vm535_vm0, %v2961_v23  ;;  %1061 = vmatpush1.bf16.msra.mxu0 %v2989_v26  ;;  %v3028_v23 = vld [vmem:[%s4045_s5 + $0xa0] sm:$0xff]   ;;  %v3031_v26 = vld [vmem:[%s4045_s5 + $0xd8] sm:$0xff]  }
  0x26   : > { %1062 = vmatprep.subr.bf16.mxu0 %v2997_v29  ;;  %934 = vmatpush1.bf16.msra.mxu1 %v3006_v39  ;;  %v3034_v39 = vld [vmem:[%s4045_s5 + $0x10] sm:$0xff]  }
  0x27   : > { %935 = vmatprep.subr.bf16.mxu1 %v3007_v40  ;;  %v3036_v40 = vld [vmem:[%s4045_s5 + $0x90] sm:$0xff]  }
  0x29   : > { %1063 = vmatpush1.bf16.msra.mxu0 %v2995_v28 }
  0x2a   : > { %1064 = vmatprep.subr.bf16.mxu0 %v3003_v36  ;;  %936 = vmatpush1.bf16.msra.mxu1 %v3012_v43  ;;  %v3039_v43 = vld [vmem:[%s4045_s5 + $0xc8] sm:$0xff]  }
  0x2b   : > { %2718 = vmatprep.subr.bf16.mxu1 %v3013_v45 }
  0x2c   : > { %2901 = vmatmul.mubr.msk.bf16.gmra.mxu0 %vm535_vm0, %v2962_v31  ;;  %v3030_v31 = vld [vmem:[%s4045_s5 + $0x18] sm:$0xff]  }
  0x2d   : > { %2904 = vmatprep.mubr.msk.bf16.mxu0 %vm535_vm0, %v2963_v32  ;;  %1065 = vmatpush1.bf16.msra.mxu0 %v3001_v38  ;;  %v3032_v32 = vld [vmem:[%s4045_s5 + $0x98] sm:$0xff]  }
  0x2e   : > { %1066 = vmatprep.subr.bf16.mxu0 %v3011_v41 }
  0x31   : > { %1067 = vmatpush1.bf16.msra.mxu0 %v3009_v42  ;;  %v3037_v42 = vld [vmem:[%s4045_s5 + $0x48] sm:$0xff]  }
  0x32   : > { %2794 = vmatprep.subr.bf16.mxu0 %v3015_v46 }
  0x34   : > { %2905 = vmatmul.mubr.msk.bf16.gmra.mxu0 %vm535_vm0, %v2964_v33 }
  0x35   : > { %1084 = vmatprep.mubr.bf16.mxu0 %v3095_v44 }
  0xd4   : > { %v2890_v47 = vpop.f32.mrf.mxu0 }
  0xd5   : > { %v609_v1 = vadd.f32 %v2890_v47, %v3315_v49 }
  0xd6   : > { %v600_v48 = vpop.f32.mrf.mxu0 }
  0xd7   : > { %v601_v51 = vadd.f32 %v3315_v49, %v600_v48  ;;  %v680_v9 = vmax.f32 %v609_v1, 0.0 }
  0xd8   : > { %v2891_v50 = vpop.f32.mrf.mxu0 }
  0xd9   : > { %v678_v55 = vmax.f32 %v601_v51, 0.0  ;;  %v612_v58 = vadd.f32 %v2891_v50, %v3315_v49  ;;  %v3038_v50 = vld [vmem:[%s4045_s5 + $0x8] sm:$0xff]  }
  0xda   : > { %v603_v52 = vpop.f32.mrf.mxu0  ;;  %v3040_v51 = vld [vmem:[%s4045_s5 + $0x88] sm:$0xff]  }
  0xdb   : > { %v604_v53 = vadd.f32 %v3315_v49, %v603_v52  ;;  %v681_v3 = vmax.f32 %v612_v58, 0.0 }
  0xdc   : > { %v2894_v54 = vpop.f32.mrf.mxu0 }
  0xdd   : > { %v679_v56 = vmax.f32 %v604_v53, 0.0  ;;  %v698_v13 = vpack.c.bf16 %v681_v3, %v680_v9  ;;  %v625_v27 = vadd.f32 %v2894_v54, %v3315_v49 }
  0xde   : > { %v616_v57 = vpop.f32.mrf.mxu0 }
  0xdf   : > { %v697_v59 = vpack.c.bf16 %v679_v56, %v678_v55  ;;  %v617_v10 = vadd.f32 %v3315_v49, %v616_v57  ;;  %v684_v36 = vmax.f32 %v625_v27, 0.0 }
  0xe0   : > { %v2895_v62 = vpop.f32.mrf.mxu0 }
  0xe1   : > { %954 = vmatmul.mubr.bf16.vlgmr.msra.gmra.mxu1 %v697_v59  ;;  %1085 = vmatmul.mubr.bf16.vlgmr.msra.gmra.mxu0 %v697_v59  ;;  %v682_v19 = vmax.f32 %v617_v10, 0.0  ;;  %v628_v28 = vadd.f32 %v2895_v62, %v3315_v49 }
  0xe2   : > { %963 = vmatprep.mubr.bf16.mxu1 %v3095_v44  ;;  %1094 = vmatprep.mubr.bf16.mxu0 %v3095_v44  ;;  %v619_v2 = vpop.f32.mrf.mxu0 }
  0xe3   : > { %2719 = vmatpush3.bf16.msra.mxu1 %v3014_v60  ;;  %2795 = vmatpush3.bf16.msra.mxu0 %v3016_v61  ;;  %v620_v11 = vadd.f32 %v3315_v49, %v619_v2  ;;  %v685_v37 = vmax.f32 %v628_v28, 0.0 }
  0xe4   : > { %v3341_v6 = vpop.f32.mrf.mxu0  ;;  %2720 = vmatprep.subr.bf16.mxu1 %v3017_v63  ;;  %2796 = vmatprep.subr.bf16.mxu0 %v3019_v0 }
  0xe5   : > { %v683_v20 = vmax.f32 %v620_v11, 0.0  ;;  %v700_v45 = vpack.c.bf16 %v685_v37, %v684_v36  ;;  %v641_v55 = vadd.f32 %v3341_v6, %v3315_v49 }
  0xe6   : > { %v632_v12 = vpop.f32.mrf.mxu0 }
  0xe7   : > { %2721 = vmatpush3.bf16.msra.mxu1 %v3018_v4  ;;  %2797 = vmatpush3.bf16.msra.mxu0 %v3020_v5  ;;  %v699_v29 = vpack.c.bf16 %v683_v20, %v682_v19  ;;  %v633_v46 = vadd.f32 %v3315_v49, %v632_v12  ;;  %v688_v58 = vmax.f32 %v641_v55, 0.0  ;;  %v741_v19 = vlaneseq }
  0xe8   : > { %v3357_v16 = vpop.f32.mrf.mxu0  ;;  %2722 = vmatprep.subr.bf16.mxu1 %v3021_v7  ;;  %2798 = vmatprep.subr.bf16.mxu0 %v3023_v8 }
  0xe9   : > { %964 = vmatmul.mubr.bf16.gmra.mxu1 %v698_v13  ;;  %1095 = vmatmul.mubr.bf16.gmra.mxu0 %v698_v13  ;;  %v686_v53 = vmax.f32 %v633_v46, 0.0  ;;  %v644_v56 = vadd.f32 %v3357_v16, %v3315_v49  ;;  %v3041_v16 = vld [vmem:[%s4045_s5 + $0x40] sm:$0xff]   ;;  %v742_v20 = vshrl.u32 %v741_v19, 7 }
  0xea   : > { %973 = vmatprep.mubr.bf16.mxu1 %v3095_v44  ;;  %1104 = vmatprep.mubr.bf16.mxu0 %v3095_v44  ;;  %v635_v21 = vpop.f32.mrf.mxu0 }
  0xeb   : > { %2723 = vmatpush3.bf16.msra.mxu1 %v3022_v14  ;;  %2799 = vmatpush3.bf16.msra.mxu0 %v3024_v15  ;;  %v636_v47 = vadd.f32 %v3315_v49, %v635_v21  ;;  %v689_v59 = vmax.f32 %v644_v56, 0.0  ;;  %v747_v21 = vsub.s32 1, %v742_v20 }
  0xec   : > { %v3373_v24 = vpop.f32.mrf.mxu0  ;;  %2724 = vmatprep.subr.bf16.mxu1 %v3025_v17  ;;  %2800 = vmatprep.subr.bf16.mxu0 %v3027_v18  ;;  %v3042_v17 = vld [vmem:[%s4045_s5] sm:$0xff]   ;;  %v3456_v18 = vld [vmem:[%s4047_s7 + $0x18] sm:$0xff]  }
  0xed   : > { %v687_v54 = vmax.f32 %v636_v47, 0.0  ;;  %v702_v60 = vpack.c.bf16 %v689_v59, %v688_v58  ;;  %v657_v1 = vadd.f32 %v3373_v24, %v3315_v49  ;;  %v751_v24 = vsub.s32 2, %v742_v20 }
  0xee   : > { %v648_v30 = vpop.f32.mrf.mxu0 }
  0xef   : > { %2725 = vmatpush3.bf16.msra.mxu1 %v3026_v22  ;;  %2801 = vmatpush3.bf16.msra.mxu0 %v3028_v23  ;;  %v701_v57 = vpack.c.bf16 %v687_v54, %v686_v53  ;;  %v649_v61 = vadd.f32 %v3315_v49, %v648_v30  ;;  %v692_v4 = vmax.f32 %v657_v1, 0.0  ;;  %v755_v22 = vsub.s32 3, %v742_v20 }
  0xf0   : > { %v2903_v33 = vpop.f32.mrf.mxu0  ;;  %2726 = vmatprep.subr.bf16.mxu1 %v3029_v25  ;;  %2802 = vmatprep.subr.bf16.mxu0 %v3031_v26  ;;  %v3460_v23 = vsub.s32 0, %v742_v20  ;;  %v739_v25 = vld [vmem:[%s4044_s4] sm:$0xf] }
  0xf1   : > { %974 = vmatmul.mubr.bf16.gmra.mxu1 %v699_v29  ;;  %1105 = vmatmul.mubr.bf16.gmra.mxu0 %v699_v29  ;;  %v690_v63 = vmax.f32 %v649_v61, 0.0  ;;  %v660_v2 = vadd.f32 %v2903_v33, %v3315_v49  ;;  %v3465_v28 = vrot.slane %v739_v25, %v747_v21  ;;  %v3467_v29 = vrot.slane %v739_v25, %v755_v22 }
  0xf2   : > { %983 = vmatprep.mubr.bf16.mxu1 %v3095_v44  ;;  %1114 = vmatprep.mubr.bf16.mxu0 %v3095_v44  ;;  %v651_v38 = vpop.f32.mrf.mxu0  ;;  %v3470_v30 = vrot.slane %v739_v25, %v3460_v23 }
  0xf3   : > { %2727 = vmatpush3.bf16.msra.mxu1 %v3030_v31  ;;  %2803 = vmatpush3.bf16.msra.mxu0 %v3032_v32  ;;  %v652_v62 = vadd.f32 %v3315_v49, %v651_v38  ;;  %v693_v5 = vmax.f32 %v660_v2, 0.0  ;;  %v3472_v31 = vrot.slane %v739_v25, %v751_v24 }
  0xf4   : > { %v2906_v41 = vpop.f32.mrf.mxu0  ;;  %2728 = vmatprep.subr.bf16.mxu1 %v3033_v34  ;;  %2804 = vmatprep.subr.bf16.mxu0 %v3035_v35 }
  0xf5   : > { %v691_v0 = vmax.f32 %v652_v62, 0.0  ;;  %v704_v7 = vpack.c.bf16 %v693_v5, %v692_v4  ;;  %v673_v12 = vadd.f32 %v2906_v41, %v3315_v49 }
  0xf6   : > { %v664_v48 = vpop.f32.mrf.mxu0 }
  0xf7   : > { %2729 = vmatpush3.bf16.msra.mxu1 %v3034_v39  ;;  %2805 = vmatpush3.bf16.msra.mxu0 %v3036_v40  ;;  %v703_v3 = vpack.c.bf16 %v691_v0, %v690_v63  ;;  %v665_v8 = vadd.f32 %v3315_v49, %v664_v48  ;;  %v696_v14 = vmax.f32 %v673_v12, 0.0 }
  0xf8   : > { %v2907_v52 = vpop.f32.mrf.mxu0  ;;  %2730 = vmatprep.subr.bf16.mxu1 %v3037_v42  ;;  %2806 = vmatprep.subr.bf16.mxu0 %v3039_v43 }
  0xf9   : > { %984 = vmatmul.mubr.bf16.gmra.mxu1 %v700_v45  ;;  %1115 = vmatmul.mubr.bf16.gmra.mxu0 %v700_v45  ;;  %v694_v10 = vmax.f32 %v665_v8, 0.0  ;;  %v706_v15 = vpack.c.bf16 %v696_v14, %v696_v14 }
  0xfa   : > { %993 = vmatprep.mubr.bf16.mxu1 %v3095_v44  ;;  %1124 = vmatprep.mubr.bf16.mxu0 %v3095_v44  ;;  %v667_v6 = vpop.f32.mrf.mxu0 }
  0xfb   : > { %2731 = vmatpush3.bf16.msra.mxu1 %v3038_v50  ;;  %2807 = vmatpush3.bf16.msra.mxu0 %v3040_v51  ;;  %v668_v9 = vadd.f32 %v3315_v49, %v667_v6  ;;  %v3043_v49 = vld [vmem:[%s4045_s5 + $0xc0] sm:$0xff]  }
  0xfc   : > { %2732 = vmatprep.subr.bf16.mxu1 %v3041_v16  ;;  %2808 = vmatprep.subr.bf16.mxu0 %v3043_v49  ;;  %v3047_v49 = vld [vmem:[%s4047_s7 + $0x8] sm:$0xff]  }
  0xfd   : > { %v695_v11 = vmax.f32 %v668_v9, 0.0 }
  0xff   : > { %v705_v13 = vpack.c.bf16 %v695_v11, %v694_v10  ;;  %2733 = vmatpush3.bf16.msra.mxu1 %v3042_v17 }
 0x100   : > { %2936 = vmatprep.subr.bf16.mxu1 %v3456_v18 }
 0x101   : > { %994 = vmatmul.mubr.bf16.gmra.mxu1 %v701_v57  ;;  %1125 = vmatmul.mubr.bf16.gmra.mxu0 %v701_v57 }
 0x102   : > { %1003 = vmatprep.mubr.bf16.mxu1 %v3095_v44  ;;  %1134 = vmatprep.mubr.bf16.mxu0 %v3095_v44 }
 0x109   : > { %1004 = vmatmul.mubr.bf16.gmra.mxu1 %v702_v60  ;;  %1135 = vmatmul.mubr.bf16.gmra.mxu0 %v702_v60 }
 0x10a   : > { %1013 = vmatprep.mubr.bf16.mxu1 %v3095_v44  ;;  %1144 = vmatprep.mubr.bf16.mxu0 %v3095_v44 }
 0x111   : > { %1014 = vmatmul.mubr.bf16.gmra.mxu1 %v703_v3  ;;  %1145 = vmatmul.mubr.bf16.gmra.mxu0 %v703_v3  ;;  %v3046_v3 = vld [vmem:[%s4047_s7 + $0x10] sm:$0xff]  }
 0x112   : > { %1023 = vmatprep.mubr.bf16.mxu1 %v3095_v44  ;;  %1154 = vmatprep.mubr.bf16.mxu0 %v3095_v44 }
 0x119   : > { %1024 = vmatmul.mubr.bf16.gmra.mxu1 %v704_v7  ;;  %1155 = vmatmul.mubr.bf16.gmra.mxu0 %v704_v7 }
 0x11a   : > { %1033 = vmatprep.mubr.bf16.mxu1 %v3095_v44  ;;  %1164 = vmatprep.mubr.bf16.mxu0 %v3095_v44 }
 0x121   : > { %1034 = vmatmul.mubr.bf16.gmra.mxu1 %v705_v13  ;;  %1165 = vmatmul.mubr.bf16.gmra.mxu0 %v705_v13 }
 0x122   : > { %1043 = vmatprep.mubr.bf16.mxu1 %v3095_v44  ;;  %1174 = vmatprep.mubr.bf16.mxu0 %v3095_v44  ;;  %v3044_v44 = vld [vmem:[%s4045_s5 + $0x80] sm:$0xff]  }
 0x123   : > { %2809 = vmatpush3.bf16.msra.mxu0 %v3044_v44 }
 0x124   : > { %2908 = vmatprep.subr.bf16.mxu0 %v3456_v18 }
 0x129   : > { %1044 = vmatmul.mubr.bf16.gmra.mxu1 %v706_v15  ;;  %1175 = vmatmul.mubr.bf16.gmra.mxu0 %v706_v15 }
 0x1a1   : > { %v955_v26 = vpop.f32.mrf.mxu1  ;;  %v1086_v27 = vpop.f32.mrf.mxu0 }
 0x1a2   : > { %v956_v40 = vadd.f32 %v955_v26, %v3470_v30  ;;  %v1087_v41 = vadd.f32 %v1086_v27, %v3472_v31 }
 0x1a3   : > { %v957_v32 = vpop.f32.mrf.mxu1  ;;  %v1088_v33 = vpop.f32.mrf.mxu0 }
 0x1a4   : > { %v958_v36 = vadd.f32 %v957_v32, %v3465_v28  ;;  %v1089_v37 = vadd.f32 %v1088_v33, %v3467_v29  ;;  %v1183_v56 = vmax.f32 %v956_v40, 0.0  ;;  %v1185_v57 = vmax.f32 %v1087_v41, 0.0 }
 0x1a5   : > { %v959_v34 = vpop.f32.mrf.mxu1  ;;  %v1090_v35 = vpop.f32.mrf.mxu0 }
 0x1a6   : > { %v960_v38 = vadd.f32 %v959_v34, %v3470_v30  ;;  %v1091_v39 = vadd.f32 %v1090_v35, %v3472_v31  ;;  %v1184_v52 = vmax.f32 %v958_v36, 0.0  ;;  %v1186_v53 = vmax.f32 %v1089_v37, 0.0 }
 0x1a7   : > { %v961_v42 = vpop.f32.mrf.mxu1  ;;  %v1092_v43 = vpop.f32.mrf.mxu0 }
 0x1a8   : > { %v962_v45 = vadd.f32 %v961_v42, %v3465_v28  ;;  %v1093_v46 = vadd.f32 %v1092_v43, %v3467_v29  ;;  %v1187_v47 = vmax.f32 %v960_v38, 0.0  ;;  %v1189_v48 = vmax.f32 %v1091_v39, 0.0 }
 0x1a9   : > { %v965_v50 = vpop.f32.mrf.mxu1  ;;  %v1096_v51 = vpop.f32.mrf.mxu0 }
 0x1aa   : > { %v1188_v54 = vmax.f32 %v962_v45, 0.0  ;;  %v1190_v55 = vmax.f32 %v1093_v46, 0.0  ;;  %v1259_v62 = vpack.c.bf16 %v1187_v47, %v1183_v56  ;;  %v1261_v63 = vpack.c.bf16 %v1189_v48, %v1185_v57 }
 0x1ab   : > { %v967_v58 = vpop.f32.mrf.mxu1  ;;  %v1098_v59 = vpop.f32.mrf.mxu0  ;;  %v966_v7 = vadd.f32 %v965_v50, %v3470_v30  ;;  %v1097_v8 = vadd.f32 %v1096_v51, %v3472_v31 }
 0x1ac   : > { %v1260_v60 = vpack.c.bf16 %v1188_v54, %v1184_v52  ;;  %v1262_v61 = vpack.c.bf16 %v1190_v55, %v1186_v53  ;;  %v968_v0 = vadd.f32 %v967_v58, %v3465_v28  ;;  %v1099_v4 = vadd.f32 %v1098_v59, %v3467_v29 }
 0x1ad   : > { %v969_v1 = vpop.f32.mrf.mxu1  ;;  %v1100_v2 = vpop.f32.mrf.mxu0  ;;  %v1191_v21 = vmax.f32 %v966_v7, 0.0  ;;  %v1193_v22 = vmax.f32 %v1097_v8, 0.0 }
 0x1ae   : > { %v970_v5 = vadd.f32 %v969_v1, %v3470_v30  ;;  %v1101_v6 = vadd.f32 %v1100_v2, %v3472_v31  ;;  %1594 = vmatprep.mubr.bf16.mxu1 %v1260_v60  ;;  %1706 = vmatprep.mubr.bf16.mxu0 %v1262_v61  ;;  %v1192_v17 = vmax.f32 %v968_v0, 0.0  ;;  %v1194_v44 = vmax.f32 %v1099_v4, 0.0 }
 0x1af   : > { %v971_v9 = vpop.f32.mrf.mxu1  ;;  %v1102_v10 = vpop.f32.mrf.mxu0  ;;  %1595 = vmatmul.mubr.bf16.vlgmr.msra.gmra.mxu1 %v1259_v62  ;;  %1707 = vmatmul.mubr.bf16.vlgmr.msra.gmra.mxu0 %v1261_v63 }
 0x1b0   : > { %v972_v11 = vadd.f32 %v971_v9, %v3465_v28  ;;  %v1103_v12 = vadd.f32 %v1102_v10, %v3467_v29  ;;  %2909 = vmatpush3.bf16.msra.mxu0 %v3456_v18  ;;  %2940 = vmatpush3.bf16.msra.mxu1 %v3456_v18  ;;  %v1195_v13 = vmax.f32 %v970_v5, 0.0  ;;  %v1197_v14 = vmax.f32 %v1101_v6, 0.0 }
 0x1b1   : > { %v975_v15 = vpop.f32.mrf.mxu1  ;;  %v1106_v16 = vpop.f32.mrf.mxu0  ;;  %2910 = vmatprep.subr.bf16.mxu0 %v3046_v3  ;;  %2937 = vmatprep.subr.bf16.mxu1 %v3046_v3 }
 0x1b2   : > { %v1196_v19 = vmax.f32 %v972_v11, 0.0  ;;  %v1198_v20 = vmax.f32 %v1103_v12, 0.0  ;;  %v976_v24 = vadd.f32 %v975_v15, %v3470_v30  ;;  %v1107_v18 = vadd.f32 %v1106_v16, %v3472_v31 }
 0x1b3   : > { %v977_v25 = vpop.f32.mrf.mxu1  ;;  %v1108_v26 = vpop.f32.mrf.mxu0  ;;  %v1263_v35 = vpack.c.bf16 %v1195_v13, %v1191_v21  ;;  %v1265_v36 = vpack.c.bf16 %v1197_v14, %v1193_v22 }
 0x1b4   : > { %v1264_v27 = vpack.c.bf16 %v1196_v19, %v1192_v17  ;;  %v1266_v32 = vpack.c.bf16 %v1198_v20, %v1194_v44  ;;  %v978_v33 = vadd.f32 %v977_v25, %v3465_v28  ;;  %v1109_v34 = vadd.f32 %v1108_v26, %v3467_v29  ;;  %2911 = vmatpush3.bf16.msra.mxu0 %v3046_v3 }
 0x1b5   : > { %v979_v37 = vpop.f32.mrf.mxu1  ;;  %v1110_v38 = vpop.f32.mrf.mxu0  ;;  %2912 = vmatprep.subr.bf16.mxu0 %v3047_v49  ;;  %2941 = vmatpush3.bf16.msra.mxu1 %v3046_v3  ;;  %v1199_v41 = vmax.f32 %v976_v24, 0.0  ;;  %v1201_v42 = vmax.f32 %v1107_v18, 0.0 }
 0x1b6   : > { %v980_v39 = vadd.f32 %v979_v37, %v3470_v30  ;;  %v1111_v40 = vadd.f32 %v1110_v38, %v3472_v31  ;;  %1602 = vmatprep.mubr.bf16.mxu1 %v1264_v27  ;;  %1714 = vmatprep.mubr.bf16.mxu0 %v1266_v32  ;;  %v1200_v43 = vmax.f32 %v978_v33, 0.0  ;;  %v1202_v45 = vmax.f32 %v1109_v34, 0.0 }
 0x1b7   : > { %v981_v46 = vpop.f32.mrf.mxu1  ;;  %v1112_v47 = vpop.f32.mrf.mxu0  ;;  %1603 = vmatmul.mubr.bf16.gmra.mxu1 %v1263_v35  ;;  %1715 = vmatmul.mubr.bf16.gmra.mxu0 %v1265_v36 }
 0x1b8   : > { %v1203_v48 = vmax.f32 %v980_v39, 0.0  ;;  %v1205_v50 = vmax.f32 %v1111_v40, 0.0  ;;  %v982_v51 = vadd.f32 %v981_v46, %v3465_v28  ;;  %v1113_v52 = vadd.f32 %v1112_v47, %v3467_v29  ;;  %2913 = vmatpush3.bf16.msra.mxu0 %v3047_v49  ;;  %2938 = vmatprep.subr.bf16.mxu1 %v3047_v49 }
 0x1b9   : > { %v985_v53 = vpop.f32.mrf.mxu1  ;;  %v1116_v54 = vpop.f32.mrf.mxu0  ;;  %2942 = vmatpush3.bf16.msra.mxu1 %v3047_v49 }
 0x1ba   : > { %v1204_v55 = vmax.f32 %v982_v51, 0.0  ;;  %v1206_v56 = vmax.f32 %v1113_v52, 0.0  ;;  %v1267_v57 = vpack.c.bf16 %v1203_v48, %v1199_v41  ;;  %v1269_v58 = vpack.c.bf16 %v1205_v50, %v1201_v42 }
 0x1bb   : > { %v987_v59 = vpop.f32.mrf.mxu1  ;;  %v1118_v60 = vpop.f32.mrf.mxu0  ;;  %v986_v5 = vadd.f32 %v985_v53, %v3470_v30  ;;  %v1117_v6 = vadd.f32 %v1116_v54, %v3472_v31 }
 0x1bc   : > { %v1268_v61 = vpack.c.bf16 %v1204_v55, %v1200_v43  ;;  %v1270_v62 = vpack.c.bf16 %v1206_v56, %v1202_v45  ;;  %v988_v63 = vadd.f32 %v987_v59, %v3465_v28  ;;  %v1119_v2 = vadd.f32 %v1118_v60, %v3467_v29 }
 0x1bd   : > { %v989_v0 = vpop.f32.mrf.mxu1  ;;  %v1120_v1 = vpop.f32.mrf.mxu0  ;;  %v1207_v44 = vmax.f32 %v986_v5, 0.0  ;;  %v1209_v19 = vmax.f32 %v1117_v6, 0.0 }
 0x1be   : > { %v990_v3 = vadd.f32 %v989_v0, %v3470_v30  ;;  %v1121_v4 = vadd.f32 %v1120_v1, %v3472_v31  ;;  %1610 = vmatprep.mubr.bf16.mxu1 %v1268_v61  ;;  %1722 = vmatprep.mubr.bf16.mxu0 %v1270_v62  ;;  %v1208_v15 = vmax.f32 %v988_v63, 0.0  ;;  %v1210_v16 = vmax.f32 %v1119_v2, 0.0 }
 0x1bf   : > { %v991_v7 = vpop.f32.mrf.mxu1  ;;  %v1122_v8 = vpop.f32.mrf.mxu0  ;;  %1611 = vmatmul.mubr.bf16.gmra.mxu1 %v1267_v57  ;;  %1723 = vmatmul.mubr.bf16.gmra.mxu0 %v1269_v58 }
 0x1c0   : > { %v992_v9 = vadd.f32 %v991_v7, %v3465_v28  ;;  %v1123_v10 = vadd.f32 %v1122_v8, %v3467_v29  ;;  %v1211_v11 = vmax.f32 %v990_v3, 0.0  ;;  %v1213_v12 = vmax.f32 %v1121_v4, 0.0 }
 0x1c1   : > { %v995_v13 = vpop.f32.mrf.mxu1  ;;  %v1126_v14 = vpop.f32.mrf.mxu0 }
 0x1c2   : > { %v1212_v49 = vmax.f32 %v992_v9, 0.0  ;;  %v1214_v17 = vmax.f32 %v1123_v10, 0.0  ;;  %v996_v20 = vadd.f32 %v995_v13, %v3470_v30  ;;  %v1127_v22 = vadd.f32 %v1126_v14, %v3472_v31 }
 0x1c3   : > { %v997_v21 = vpop.f32.mrf.mxu1  ;;  %v1128_v24 = vpop.f32.mrf.mxu0  ;;  %v1271_v27 = vpack.c.bf16 %v1211_v11, %v1207_v44  ;;  %v1273_v32 = vpack.c.bf16 %v1213_v12, %v1209_v19 }
 0x1c4   : > { %v1272_v18 = vpack.c.bf16 %v1212_v49, %v1208_v15  ;;  %v1274_v25 = vpack.c.bf16 %v1214_v17, %v1210_v16  ;;  %v998_v26 = vadd.f32 %v997_v21, %v3465_v28  ;;  %v1129_v34 = vadd.f32 %v1128_v24, %v3467_v29 }
 0x1c5   : > { %v999_v33 = vpop.f32.mrf.mxu1  ;;  %v1130_v35 = vpop.f32.mrf.mxu0  ;;  %v1215_v38 = vmax.f32 %v996_v20, 0.0  ;;  %v1217_v40 = vmax.f32 %v1127_v22, 0.0 }
 0x1c6   : > { %v1000_v36 = vadd.f32 %v999_v33, %v3470_v30  ;;  %1618 = vmatprep.mubr.bf16.mxu1 %v1272_v18  ;;  %1730 = vmatprep.mubr.bf16.mxu0 %v1274_v25  ;;  %v1131_v37 = vadd.f32 %v1130_v35, %v3472_v31  ;;  %v1216_v39 = vmax.f32 %v998_v26, 0.0  ;;  %v1218_v48 = vmax.f32 %v1129_v34, 0.0 }
 0x1c7   : > { %v1001_v41 = vpop.f32.mrf.mxu1  ;;  %1619 = vmatmul.mubr.bf16.gmra.mxu1 %v1271_v27  ;;  %1731 = vmatmul.mubr.bf16.gmra.mxu0 %v1273_v32  ;;  %v1132_v42 = vpop.f32.mrf.mxu0 }
 0x1c8   : > { %v1219_v43 = vmax.f32 %v1000_v36, 0.0  ;;  %v1002_v45 = vadd.f32 %v1001_v41, %v3465_v28  ;;  %v1221_v46 = vmax.f32 %v1131_v37, 0.0  ;;  %v1133_v47 = vadd.f32 %v1132_v42, %v3467_v29 }
 0x1c9   : > { %v1005_v50 = vpop.f32.mrf.mxu1  ;;  %v1136_v51 = vpop.f32.mrf.mxu0 }
 0x1ca   : > { %v1220_v52 = vmax.f32 %v1002_v45, 0.0  ;;  %v1275_v53 = vpack.c.bf16 %v1219_v43, %v1215_v38  ;;  %v1006_v54 = vadd.f32 %v1005_v50, %v3470_v30  ;;  %v1222_v55 = vmax.f32 %v1133_v47, 0.0 }
 0x1cb   : > { %v1007_v56 = vpop.f32.mrf.mxu1  ;;  %v1137_v57 = vadd.f32 %v1136_v51, %v3472_v31  ;;  %v1138_v58 = vpop.f32.mrf.mxu0  ;;  %v1277_v60 = vpack.c.bf16 %v1221_v46, %v1217_v40 }
 0x1cc   : > { %v1276_v59 = vpack.c.bf16 %v1220_v52, %v1216_v39  ;;  %v1008_v61 = vadd.f32 %v1007_v56, %v3465_v28  ;;  %v1139_v62 = vadd.f32 %v1138_v58, %v3467_v29  ;;  %v1278_v63 = vpack.c.bf16 %v1222_v55, %v1218_v48 }
 0x1cd   : > { %v1009_v0 = vpop.f32.mrf.mxu1  ;;  %v1140_v1 = vpop.f32.mrf.mxu0  ;;  %v1223_v4 = vmax.f32 %v1006_v54, 0.0  ;;  %v1225_v6 = vmax.f32 %v1137_v57, 0.0 }
 0x1ce   : > { %v1010_v2 = vadd.f32 %v1009_v0, %v3470_v30  ;;  %1626 = vmatprep.mubr.bf16.mxu1 %v1276_v59  ;;  %v1141_v3 = vadd.f32 %v1140_v1, %v3472_v31  ;;  %v1224_v5 = vmax.f32 %v1008_v61, 0.0  ;;  %v1226_v7 = vmax.f32 %v1139_v62, 0.0  ;;  %1738 = vmatprep.mubr.bf16.mxu0 %v1278_v63 }
 0x1cf   : > { %v1011_v8 = vpop.f32.mrf.mxu1  ;;  %1627 = vmatmul.mubr.bf16.gmra.mxu1 %v1275_v53  ;;  %v1142_v9 = vpop.f32.mrf.mxu0  ;;  %1739 = vmatmul.mubr.bf16.gmra.mxu0 %v1277_v60 }
 0x1d0   : > { %v1227_v10 = vmax.f32 %v1010_v2, 0.0  ;;  %v1012_v11 = vadd.f32 %v1011_v8, %v3465_v28  ;;  %v1229_v12 = vmax.f32 %v1141_v3, 0.0  ;;  %v1143_v13 = vadd.f32 %v1142_v9, %v3467_v29 }
 0x1d1   : > { %v1015_v14 = vpop.f32.mrf.mxu1  ;;  %v1146_v15 = vpop.f32.mrf.mxu0 }
 0x1d2   : > { %v1228_v16 = vmax.f32 %v1012_v11, 0.0  ;;  %v1230_v49 = vmax.f32 %v1143_v13, 0.0  ;;  %v1279_v17 = vpack.c.bf16 %v1227_v10, %v1223_v4  ;;  %v1016_v44 = vadd.f32 %v1015_v14, %v3470_v30 }
 0x1d3   : > { %v1017_v19 = vpop.f32.mrf.mxu1  ;;  %v1147_v20 = vadd.f32 %v1146_v15, %v3472_v31  ;;  %v1148_v21 = vpop.f32.mrf.mxu0  ;;  %v1281_v24 = vpack.c.bf16 %v1229_v12, %v1225_v6 }
 0x1d4   : > { %v1280_v22 = vpack.c.bf16 %v1228_v16, %v1224_v5  ;;  %v1282_v18 = vpack.c.bf16 %v1230_v49, %v1226_v7  ;;  %v1018_v25 = vadd.f32 %v1017_v19, %v3465_v28  ;;  %v1149_v27 = vadd.f32 %v1148_v21, %v3467_v29 }
 0x1d5   : > { %v1019_v26 = vpop.f32.mrf.mxu1  ;;  %v1150_v32 = vpop.f32.mrf.mxu0  ;;  %v1231_v35 = vmax.f32 %v1016_v44, 0.0  ;;  %v1233_v37 = vmax.f32 %v1147_v20, 0.0 }
 0x1d6   : > { %1634 = vmatprep.mubr.bf16.mxu1 %v1280_v22  ;;  %1746 = vmatprep.mubr.bf16.mxu0 %v1282_v18  ;;  %v1020_v33 = vadd.f32 %v1019_v26, %v3470_v30  ;;  %v1151_v34 = vadd.f32 %v1150_v32, %v3472_v31  ;;  %v1232_v36 = vmax.f32 %v1018_v25, 0.0  ;;  %v1234_v45 = vmax.f32 %v1149_v27, 0.0 }
 0x1d7   : > { %1635 = vmatmul.mubr.bf16.gmra.mxu1 %v1279_v17  ;;  %v1021_v38 = vpop.f32.mrf.mxu1  ;;  %v1152_v39 = vpop.f32.mrf.mxu0  ;;  %1747 = vmatmul.mubr.bf16.gmra.mxu0 %v1281_v24 }
 0x1d8   : > { %v1235_v40 = vmax.f32 %v1020_v33, 0.0  ;;  %v1022_v41 = vadd.f32 %v1021_v38, %v3465_v28  ;;  %v1237_v42 = vmax.f32 %v1151_v34, 0.0  ;;  %v1153_v43 = vadd.f32 %v1152_v39, %v3467_v29 }
 0x1d9   : > { %v1025_v46 = vpop.f32.mrf.mxu1  ;;  %v1156_v47 = vpop.f32.mrf.mxu0 }
 0x1da   : > { %v1236_v48 = vmax.f32 %v1022_v41, 0.0  ;;  %v1283_v50 = vpack.c.bf16 %v1235_v40, %v1231_v35  ;;  %v1026_v51 = vadd.f32 %v1025_v46, %v3470_v30  ;;  %v1238_v52 = vmax.f32 %v1153_v43, 0.0 }
 0x1db   : > { %v1027_v53 = vpop.f32.mrf.mxu1  ;;  %v1157_v54 = vadd.f32 %v1156_v47, %v3472_v31  ;;  %v1158_v55 = vpop.f32.mrf.mxu0  ;;  %v1285_v57 = vpack.c.bf16 %v1237_v42, %v1233_v37 }
 0x1dc   : > { %v1284_v56 = vpack.c.bf16 %v1236_v48, %v1232_v36  ;;  %v1028_v58 = vadd.f32 %v1027_v53, %v3465_v28  ;;  %v1159_v59 = vadd.f32 %v1158_v55, %v3467_v29  ;;  %v1286_v60 = vpack.c.bf16 %v1238_v52, %v1234_v45 }
 0x1dd   : > { %v1029_v61 = vpop.f32.mrf.mxu1  ;;  %v1160_v62 = vpop.f32.mrf.mxu0  ;;  %v1239_v1 = vmax.f32 %v1026_v51, 0.0  ;;  %v1241_v3 = vmax.f32 %v1157_v54, 0.0 }
 0x1de   : > { %v1030_v63 = vadd.f32 %v1029_v61, %v3470_v30  ;;  %1642 = vmatprep.mubr.bf16.mxu1 %v1284_v56  ;;  %v1161_v0 = vadd.f32 %v1160_v62, %v3472_v31  ;;  %v1240_v2 = vmax.f32 %v1028_v58, 0.0  ;;  %v1242_v4 = vmax.f32 %v1159_v59, 0.0  ;;  %1754 = vmatprep.mubr.bf16.mxu0 %v1286_v60 }
 0x1df   : > { %v1031_v5 = vpop.f32.mrf.mxu1  ;;  %1643 = vmatmul.mubr.bf16.gmra.mxu1 %v1283_v50  ;;  %v1162_v6 = vpop.f32.mrf.mxu0  ;;  %1755 = vmatmul.mubr.bf16.gmra.mxu0 %v1285_v57 }
 0x1e0   : > { %v1243_v7 = vmax.f32 %v1030_v63, 0.0  ;;  %v1032_v8 = vadd.f32 %v1031_v5, %v3465_v28  ;;  %v1245_v9 = vmax.f32 %v1161_v0, 0.0  ;;  %v1163_v10 = vadd.f32 %v1162_v6, %v3467_v29  ;;  %v3564_v5 = vld [vmem:[%s4046_s6] ss:$0 sm:$0xff] }
 0x1e1   : > { %v1035_v11 = vpop.f32.mrf.mxu1  ;;  %v1166_v12 = vpop.f32.mrf.mxu0 }
 0x1e2   : > { %v1244_v13 = vmax.f32 %v1032_v8, 0.0  ;;  %v1246_v14 = vmax.f32 %v1163_v10, 0.0  ;;  %v1287_v15 = vpack.c.bf16 %v1243_v7, %v1239_v1  ;;  %v1289_v16 = vpack.c.bf16 %v1245_v9, %v1241_v3 }
 0x1e3   : > { %v1036_v49 = vadd.f32 %v1035_v11, %v3470_v30  ;;  %v1037_v17 = vpop.f32.mrf.mxu1  ;;  %v1167_v44 = vadd.f32 %v1166_v12, %v3472_v31  ;;  %v1168_v19 = vpop.f32.mrf.mxu0 }
 0x1e4   : > { %v1288_v20 = vpack.c.bf16 %v1244_v13, %v1240_v2  ;;  %v1290_v21 = vpack.c.bf16 %v1246_v14, %v1242_v4  ;;  %v1038_v22 = vadd.f32 %v1037_v17, %v3465_v28  ;;  %v1169_v24 = vadd.f32 %v1168_v19, %v3467_v29 }
 0x1e5   : > { %v1039_v18 = vpop.f32.mrf.mxu1  ;;  %v1170_v25 = vpop.f32.mrf.mxu0  ;;  %v1247_v32 = vmax.f32 %v1036_v49, 0.0  ;;  %v1249_v34 = vmax.f32 %v1167_v44, 0.0 }
 0x1e6   : > { %1650 = vmatprep.mubr.bf16.mxu1 %v1288_v20  ;;  %1762 = vmatprep.mubr.bf16.mxu0 %v1290_v21  ;;  %v1040_v26 = vadd.f32 %v1039_v18, %v3470_v30  ;;  %v1171_v27 = vadd.f32 %v1170_v25, %v3472_v31  ;;  %v1248_v33 = vmax.f32 %v1038_v22, 0.0  ;;  %v1250_v35 = vmax.f32 %v1169_v24, 0.0 }
 0x1e7   : > { %1651 = vmatmul.mubr.bf16.gmra.mxu1 %v1287_v15  ;;  %v1041_v36 = vpop.f32.mrf.mxu1  ;;  %v1172_v37 = vpop.f32.mrf.mxu0  ;;  %1763 = vmatmul.mubr.bf16.gmra.mxu0 %v1289_v16 }
 0x1e8   : > { %v1251_v38 = vmax.f32 %v1040_v26, 0.0  ;;  %v1042_v39 = vadd.f32 %v1041_v36, %v3465_v28  ;;  %v1253_v40 = vmax.f32 %v1171_v27, 0.0  ;;  %v1173_v41 = vadd.f32 %v1172_v37, %v3467_v29 }
 0x1e9   : > { %v1045_v42 = vpop.f32.mrf.mxu1  ;;  %v1176_v43 = vpop.f32.mrf.mxu0 }
 0x1ea   : > { %v1252_v45 = vmax.f32 %v1042_v39, 0.0  ;;  %v1254_v46 = vmax.f32 %v1173_v41, 0.0  ;;  %v1291_v47 = vpack.c.bf16 %v1251_v38, %v1247_v32  ;;  %v1293_v48 = vpack.c.bf16 %v1253_v40, %v1249_v34 }
 0x1eb   : > { %v1046_v50 = vadd.f32 %v1045_v42, %v3470_v30  ;;  %v1047_v51 = vpop.f32.mrf.mxu1  ;;  %v1177_v52 = vadd.f32 %v1176_v43, %v3472_v31  ;;  %v1178_v53 = vpop.f32.mrf.mxu0 }
 0x1ec   : > { %v1292_v54 = vpack.c.bf16 %v1252_v45, %v1248_v33  ;;  %v1294_v55 = vpack.c.bf16 %v1254_v46, %v1250_v35  ;;  %v1048_v56 = vadd.f32 %v1047_v51, %v3465_v28  ;;  %v1179_v57 = vadd.f32 %v1178_v53, %v3467_v29  ;;  %v3048_v29 = vld [vmem:[%s4047_s7] sm:$0xff]  }
 0x1ed   : > { %v1049_v58 = vpop.f32.mrf.mxu1  ;;  %v1180_v59 = vpop.f32.mrf.mxu0  ;;  %v1255_v62 = vmax.f32 %v1046_v50, 0.0  ;;  %v1257_v1 = vmax.f32 %v1177_v52, 0.0  ;;  %2914 = vmatprep.subr.bf16.mxu0 %v3048_v29  ;;  %2939 = vmatprep.subr.bf16.mxu1 %v3048_v29 }
 0x1ee   : > { %1658 = vmatprep.mubr.bf16.mxu1 %v1292_v54  ;;  %v1256_v60 = vmax.f32 %v1048_v56, 0.0  ;;  %1770 = vmatprep.mubr.bf16.mxu0 %v1294_v55  ;;  %v1258_v61 = vmax.f32 %v1179_v57, 0.0 }
 0x1ef   : > { %1659 = vmatmul.mubr.bf16.gmra.mxu1 %v1291_v47  ;;  %v1050_v63 = vpop.f32.mrf.mxu1  ;;  %v1181_v30 = vpop.f32.mrf.mxu0  ;;  %1771 = vmatmul.mubr.bf16.gmra.mxu0 %v1293_v48  ;;  %v1295_v2 = vpack.c.bf16 %v1255_v62, %v1255_v62  ;;  %v1297_v28 = vpack.c.bf16 %v1257_v1, %v1257_v1 }
 0x1f0   : > { %v1296_v0 = vpack.c.bf16 %v1256_v60, %v1256_v60  ;;  %v1298_v31 = vpack.c.bf16 %v1258_v61, %v1258_v61  ;;  %2915 = vmatpush3.bf16.msra.mxu0 %v3048_v29  ;;  %2943 = vmatpush3.bf16.msra.mxu1 %v3048_v29 }
 0x1f2   : > { %1666 = vmatprep.mubr.bf16.mxu1 %v1296_v0  ;;  %1778 = vmatprep.mubr.bf16.mxu0 %v1298_v31 }
 0x1f7   : > { %1667 = vmatmul.mubr.bf16.gmra.mxu1 %v1295_v2  ;;  %1779 = vmatmul.mubr.bf16.gmra.mxu0 %v1297_v28 }
 0x26f   : > { %v2734_v3 = vpop.f32.mrf.mxu1  ;;  %v2810_v4 = vpop.f32.mrf.mxu0 }
 0x271   : > { %v2735_v6 = vpop.f32.mrf.mxu1  ;;  %v2811_v7 = vpop.f32.mrf.mxu0 }
 0x272   : > { %v2736_v8 = vadd.f32 %v2735_v6, %v2734_v3  ;;  %v2812_v14 = vadd.f32 %v2811_v7, %v2810_v4 }
 0x273   : > { %v2737_v9 = vpop.f32.mrf.mxu1  ;;  %v2813_v10 = vpop.f32.mrf.mxu0 }
 0x274   : > { %v1597_v11 = vadd.f32 %v2736_v8, %v3564_v5 }
 0x275   : > { %v2738_v12 = vpop.f32.mrf.mxu1  ;;  %v2814_v13 = vpop.f32.mrf.mxu0 }
 0x276   : > { %v2739_v15 = vadd.f32 %v2738_v12, %v2737_v9  ;;  %v1709_v17 = vadd.f32 %v2812_v14, %v1597_v11  ;;  %v2815_v19 = vadd.f32 %v2814_v13, %v2813_v10 }
 0x277   : > { %v2740_v16 = vpop.f32.mrf.mxu1  ;;  %v2816_v49 = vpop.f32.mrf.mxu0 }
 0x278   : > { %v1600_v44 = vadd.f32 %v2739_v15, %v3564_v5  ;;  %v1786_v26 = vmax.f32 %v1709_v17, 0.0 }
 0x279   : > { %v2741_v20 = vpop.f32.mrf.mxu1  ;;  %v2817_v21 = vpop.f32.mrf.mxu0 }
 0x27a   : > { %v1712_v22 = vadd.f32 %v2815_v19, %v1600_v44  ;;  %v2742_v24 = vadd.f32 %v2741_v20, %v2740_v16  ;;  %v2818_v36 = vadd.f32 %v2817_v21, %v2816_v49 }
 0x27b   : > { %v2743_v18 = vpop.f32.mrf.mxu1  ;;  %v2819_v25 = vpop.f32.mrf.mxu0 }
 0x27c   : > { %v1787_v27 = vmax.f32 %v1712_v22, 0.0  ;;  %v1605_v32 = vadd.f32 %v2742_v24, %v3564_v5 }
 0x27d   : > { %v2744_v33 = vpop.f32.mrf.mxu1  ;;  %v2820_v34 = vpop.f32.mrf.mxu0 }
 0x27e   : > { %v1805_v35 = vpack.c.bf16 %v1787_v27, %v1786_v26  ;;  %v2745_v37 = vadd.f32 %v2744_v33, %v2743_v18  ;;  %v1717_v40 = vadd.f32 %v2818_v36, %v1605_v32  ;;  %v2821_v42 = vadd.f32 %v2820_v34, %v2819_v25 }
 0x27f   : > { %v2746_v38 = vpop.f32.mrf.mxu1  ;;  %v2822_v39 = vpop.f32.mrf.mxu0 }
 0x280   : > { %v1608_v41 = vadd.f32 %v2745_v37, %v3564_v5  ;;  %2916 = vmatprep.mubr.msk.bf16.mxu0 %vm1854_vm1, %v1805_v35  ;;  %v1788_v51 = vmax.f32 %v1717_v40, 0.0 }
 0x281   : > { %v2747_v43 = vpop.f32.mrf.mxu1  ;;  %v2823_v45 = vpop.f32.mrf.mxu0 }
 0x282   : > { %v1720_v46 = vadd.f32 %v2821_v42, %v1608_v41  ;;  %v2748_v47 = vadd.f32 %v2747_v43, %v2746_v38  ;;  %v2824_v54 = vadd.f32 %v2823_v45, %v2822_v39 }
 0x283   : > { %v2749_v48 = vpop.f32.mrf.mxu1  ;;  %v2825_v50 = vpop.f32.mrf.mxu0 }
 0x284   : > { %v1789_v52 = vmax.f32 %v1720_v46, 0.0  ;;  %v1613_v53 = vadd.f32 %v2748_v47, %v3564_v5 }
 0x285   : > { %v2750_v55 = vpop.f32.mrf.mxu1  ;;  %v2826_v56 = vpop.f32.mrf.mxu0 }
 0x286   : > { %v1806_v57 = vpack.c.bf16 %v1789_v52, %v1788_v51  ;;  %v2751_v58 = vadd.f32 %v2750_v55, %v2749_v48  ;;  %v1725_v61 = vadd.f32 %v2824_v54, %v1613_v53  ;;  %v2827_v63 = vadd.f32 %v2826_v56, %v2825_v50 }
 0x287   : > { %v2752_v59 = vpop.f32.mrf.mxu1  ;;  %v2828_v60 = vpop.f32.mrf.mxu0 }
 0x288   : > { %v1616_v62 = vadd.f32 %v2751_v58, %v3564_v5  ;;  %2917 = vmatmul.mubr.msk.bf16.vlgmr.msra.gmra.mxu0 %vm1854_vm1, %v1806_v57  ;;  %v1790_v29 = vmax.f32 %v1725_v61, 0.0 }
 0x289   : > { %v2753_v30 = vpop.f32.mrf.mxu1  ;;  %v2829_v0 = vpop.f32.mrf.mxu0 }
 0x28a   : > { %v1728_v1 = vadd.f32 %v2827_v63, %v1616_v62  ;;  %v2754_v31 = vadd.f32 %v2753_v30, %v2752_v59  ;;  %v2830_v9 = vadd.f32 %v2829_v0, %v2828_v60 }
 0x28b   : > { %v2755_v2 = vpop.f32.mrf.mxu1  ;;  %v2831_v28 = vpop.f32.mrf.mxu0 }
 0x28c   : > { %v1791_v3 = vmax.f32 %v1728_v1, 0.0  ;;  %v1621_v4 = vadd.f32 %v2754_v31, %v3564_v5 }
 0x28d   : > { %v2756_v6 = vpop.f32.mrf.mxu1  ;;  %v2832_v7 = vpop.f32.mrf.mxu0 }
 0x28e   : > { %v1807_v8 = vpack.c.bf16 %v1791_v3, %v1790_v29  ;;  %v2757_v10 = vadd.f32 %v2756_v6, %v2755_v2  ;;  %v1733_v12 = vadd.f32 %v2830_v9, %v1621_v4  ;;  %v2833_v14 = vadd.f32 %v2832_v7, %v2831_v28 }
 0x28f   : > { %v2758_v11 = vpop.f32.mrf.mxu1  ;;  %v2834_v15 = vpop.f32.mrf.mxu0 }
 0x290   : > { %v1624_v13 = vadd.f32 %v2757_v10, %v3564_v5  ;;  %2920 = vmatprep.mubr.msk.bf16.mxu1 %vm1854_vm1, %v1807_v8  ;;  %v1792_v21 = vmax.f32 %v1733_v12, 0.0 }
 0x291   : > { %v2759_v16 = vpop.f32.mrf.mxu1  ;;  %v2835_v44 = vpop.f32.mrf.mxu0 }
 0x292   : > { %v1736_v49 = vadd.f32 %v2833_v14, %v1624_v13  ;;  %v2760_v17 = vadd.f32 %v2759_v16, %v2758_v11  ;;  %v2836_v20 = vadd.f32 %v2835_v44, %v2834_v15 }
 0x293   : > { %v2761_v19 = vpop.f32.mrf.mxu1  ;;  %v2837_v18 = vpop.f32.mrf.mxu0 }
 0x294   : > { %v1793_v22 = vmax.f32 %v1736_v49, 0.0  ;;  %v1629_v24 = vadd.f32 %v2760_v17, %v3564_v5 }
 0x295   : > { %v2762_v25 = vpop.f32.mrf.mxu1  ;;  %v2838_v33 = vpop.f32.mrf.mxu0 }
 0x296   : > { %v1808_v26 = vpack.c.bf16 %v1793_v22, %v1792_v21  ;;  %v1741_v27 = vadd.f32 %v2836_v20, %v1629_v24  ;;  %v2763_v32 = vadd.f32 %v2762_v25, %v2761_v19  ;;  %v2839_v35 = vadd.f32 %v2838_v33, %v2837_v18 }
 0x297   : > { %v2764_v34 = vpop.f32.mrf.mxu1  ;;  %v2840_v37 = vpop.f32.mrf.mxu0 }
 0x298   : > { %v1632_v36 = vadd.f32 %v2763_v32, %v3564_v5  ;;  %2921 = vmatmul.mubr.msk.bf16.vlgmr.msra.gmra.mxu1 %vm1854_vm1, %v1808_v26  ;;  %v1794_v39 = vmax.f32 %v1741_v27, 0.0 }
 0x299   : > { %v2765_v38 = vpop.f32.mrf.mxu1  ;;  %v2841_v42 = vpop.f32.mrf.mxu0 }
 0x29a   : > { %v1744_v40 = vadd.f32 %v2839_v35, %v1632_v36  ;;  %v2766_v41 = vadd.f32 %v2765_v38, %v2764_v34  ;;  %v2842_v45 = vadd.f32 %v2841_v42, %v2840_v37 }
 0x29b   : > { %v2767_v43 = vpop.f32.mrf.mxu1  ;;  %v2843_v48 = vpop.f32.mrf.mxu0 }
 0x29c   : > { %v1795_v46 = vmax.f32 %v1744_v40, 0.0  ;;  %v1637_v47 = vadd.f32 %v2766_v41, %v3564_v5 }
 0x29d   : > { %v2768_v50 = vpop.f32.mrf.mxu1  ;;  %v2844_v54 = vpop.f32.mrf.mxu0 }
 0x29e   : > { %v1809_v51 = vpack.c.bf16 %v1795_v46, %v1794_v39  ;;  %v1749_v52 = vadd.f32 %v2842_v45, %v1637_v47  ;;  %v2769_v53 = vadd.f32 %v2768_v50, %v2767_v43  ;;  %v2845_v55 = vadd.f32 %v2844_v54, %v2843_v48 }
 0x29f   : > { %v2770_v56 = vpop.f32.mrf.mxu1  ;;  %v2846_v58 = vpop.f32.mrf.mxu0 }
 0x2a0   : > { %v1640_v57 = vadd.f32 %v2769_v53, %v3564_v5  ;;  %2924 = vmatprep.mubr.msk.bf16.mxu1 %vm1854_vm1, %v1809_v51  ;;  %v1796_v60 = vmax.f32 %v1749_v52, 0.0 }
 0x2a1   : > { %v2771_v59 = vpop.f32.mrf.mxu1  ;;  %v2847_v63 = vpop.f32.mrf.mxu0 }
 0x2a2   : > { %v1752_v61 = vadd.f32 %v2845_v55, %v1640_v57  ;;  %v2772_v62 = vadd.f32 %v2771_v59, %v2770_v56  ;;  %v2848_v0 = vadd.f32 %v2847_v63, %v2846_v58 }
 0x2a3   : > { %v2773_v30 = vpop.f32.mrf.mxu1  ;;  %v2849_v2 = vpop.f32.mrf.mxu0 }
 0x2a4   : > { %v1797_v1 = vmax.f32 %v1752_v61, 0.0  ;;  %v1645_v31 = vadd.f32 %v2772_v62, %v3564_v5 }
 0x2a5   : > { %v2774_v28 = vpop.f32.mrf.mxu1  ;;  %v2850_v6 = vpop.f32.mrf.mxu0 }
 0x2a6   : > { %v1810_v29 = vpack.c.bf16 %v1797_v1, %v1796_v60  ;;  %v1757_v3 = vadd.f32 %v2848_v0, %v1645_v31  ;;  %v2775_v4 = vadd.f32 %v2774_v28, %v2773_v30  ;;  %v2851_v8 = vadd.f32 %v2850_v6, %v2849_v2 }
 0x2a7   : > { %v2776_v7 = vpop.f32.mrf.mxu1  ;;  %v2852_v10 = vpop.f32.mrf.mxu0 }
 0x2a8   : > { %2925 = vmatmul.mubr.msk.bf16.gmra.mxu1 %vm1854_vm1, %v1810_v29  ;;  %v1648_v9 = vadd.f32 %v2775_v4, %v3564_v5  ;;  %v1798_v12 = vmax.f32 %v1757_v3, 0.0  ;;  %v3598_v29 = vld [vmem:[%s4049_s9] sm:$0x1] }
 0x2a9   : > { %v2777_v11 = vpop.f32.mrf.mxu1  ;;  %v2853_v15 = vpop.f32.mrf.mxu0  ;;  %v1999_v3 = vsub.f32 1.0, %v3598_v29 }
 0x2aa   : > { %v1760_v13 = vadd.f32 %v2851_v8, %v1648_v9  ;;  %v2778_v14 = vadd.f32 %v2777_v11, %v2776_v7  ;;  %v2854_v49 = vadd.f32 %v2853_v15, %v2852_v10  ;;  %v3609_v8 = vld [vmem:[%s4048_s8] ss:$0 sm:$0xff] }
 0x2ab   : > { %v2779_v16 = vpop.f32.mrf.mxu1  ;;  %v2855_v19 = vpop.f32.mrf.mxu0  ;;  %v2000_v6 = vmul.f32 3e+38, %v1999_v3 }
 0x2ac   : > { %v1799_v17 = vmax.f32 %v1760_v13, 0.0  ;;  %v1653_v44 = vadd.f32 %v2778_v14, %v3564_v5 }
 0x2ad   : > { %v2780_v20 = vpop.f32.mrf.mxu1  ;;  %v2856_v18 = vpop.f32.mrf.mxu0  ;;  %v3612_v9 = vrot.slane %v2000_v6, %v3460_v23 }
 0x2ae   : > { %v1811_v21 = vpack.c.bf16 %v1799_v17, %v1798_v12  ;;  %v1765_v22 = vadd.f32 %v2854_v49, %v1653_v44  ;;  %v2781_v24 = vadd.f32 %v2780_v20, %v2779_v16  ;;  %v2857_v25 = vadd.f32 %v2856_v18, %v2855_v19 }
 0x2af   : > { %v2782_v26 = vpop.f32.mrf.mxu1  ;;  %v2858_v32 = vpop.f32.mrf.mxu0 }
 0x2b0   : > { %v1656_v27 = vadd.f32 %v2781_v24, %v3564_v5  ;;  %2928 = vmatprep.mubr.msk.bf16.mxu1 %vm1854_vm1, %v1811_v21  ;;  %v1800_v34 = vmax.f32 %v1765_v22, 0.0 }
 0x2b1   : > { %v2783_v33 = vpop.f32.mrf.mxu1  ;;  %v2859_v37 = vpop.f32.mrf.mxu0 }
 0x2b2   : > { %v1768_v35 = vadd.f32 %v2857_v25, %v1656_v27  ;;  %v2784_v36 = vadd.f32 %v2783_v33, %v2782_v26  ;;  %v2860_v39 = vadd.f32 %v2859_v37, %v2858_v32 }
 0x2b3   : > { %v2785_v38 = vpop.f32.mrf.mxu1  ;;  %v2861_v42 = vpop.f32.mrf.mxu0 }
 0x2b4   : > { %v1801_v40 = vmax.f32 %v1768_v35, 0.0  ;;  %v1661_v41 = vadd.f32 %v2784_v36, %v3564_v5 }
 0x2b5   : > { %v2786_v43 = vpop.f32.mrf.mxu1  ;;  %v2862_v48 = vpop.f32.mrf.mxu0 }
 0x2b6   : > { %v1812_v45 = vpack.c.bf16 %v1801_v40, %v1800_v34  ;;  %v1773_v46 = vadd.f32 %v2860_v39, %v1661_v41  ;;  %v2787_v47 = vadd.f32 %v2786_v43, %v2785_v38  ;;  %v2863_v51 = vadd.f32 %v2862_v48, %v2861_v42 }
 0x2b7   : > { %v2788_v50 = vpop.f32.mrf.mxu1  ;;  %v2864_v53 = vpop.f32.mrf.mxu0 }
 0x2b8   : > { %2929 = vmatmul.mubr.msk.bf16.gmra.mxu1 %vm1854_vm1, %v1812_v45  ;;  %v1664_v52 = vadd.f32 %v2787_v47, %v3564_v5  ;;  %v1802_v55 = vmax.f32 %v1773_v46, 0.0 }
 0x2b9   : > { %v2789_v54 = vpop.f32.mrf.mxu1  ;;  %v2865_v58 = vpop.f32.mrf.mxu0 }
 0x2ba   : > { %v1776_v56 = vadd.f32 %v2863_v51, %v1664_v52  ;;  %v2790_v57 = vadd.f32 %v2789_v54, %v2788_v50  ;;  %v2866_v59 = vadd.f32 %v2865_v58, %v2864_v53 }
 0x2bb   : > { %v2791_v60 = vpop.f32.mrf.mxu1  ;;  %v2867_v63 = vpop.f32.mrf.mxu0 }
 0x2bc   : > { %v1803_v61 = vmax.f32 %v1776_v56, 0.0  ;;  %v1669_v62 = vadd.f32 %v2790_v57, %v3564_v5  ;;  %v1998_v5 = vld [vmem:[%s4050_s10] sm:$0x1] }
 0x2bd   : > { %v2792_v30 = vpop.f32.mrf.mxu1  ;;  %v2868_v31 = vpop.f32.mrf.mxu0  ;;  %v2001_v4 = vsub.f32 1.0, %v1998_v5 }
 0x2be   : > { %v1813_v0 = vpack.c.bf16 %v1803_v61, %v1802_v55  ;;  %v1781_v1 = vadd.f32 %v2866_v59, %v1669_v62 }
 0x2bf   : > { %v2002_v7 = vmul.f32 3e+38, %v2001_v4 }
 0x2c0   : > { %v1804_v2 = vmax.f32 %v1781_v1, 0.0  ;;  %2932 = vmatprep.mubr.msk.bf16.mxu1 %vm1854_vm1, %v1813_v0 }
 0x2c1   : > { %v3615_v10 = vrot.slane %v2002_v7, %v3460_v23 }
 0x2c2   : > { %v1814_v28 = vpack.c.bf16 %v1804_v2, %v1804_v2 }
 0x2c4   : > { %2933 = vmatmul.mubr.msk.bf16.gmra.mxu1 %vm1854_vm1, %v1814_v28 }
 0x348   : > { %v2918_v11 = vpop.f32.mrf.mxu0 }
 0x349   : > { %v3618_v12 = vadd.f32 %v2918_v11, %v3609_v8 }
 0x34a   : > { %v1919_v13 = vpop.f32.mrf.mxu0 }
 0x34b   : > { %v3621_v14 = vadd.f32 %v3609_v8, %v1919_v13  ;;  %v2131_v15 = vadd.f32 %v3615_v10, %v3618_v12  ;;  %v2011_v16 = vadd.f32 %v3612_v9, %v3618_v12  ;;  %v2068_v49 = vsub.f32 %v3618_v12, %v3612_v9 }
 0x34c   : > { %v2919_v44 = vpop.f32.mrf.mxu0  ;;  %v2188_v20 = vsub.f32 %v3618_v12, %v3615_v10 }
 0x34d   : > { %2152 = vmin.xlane.f32.xlu0 %v2131_v15  ;;  %2032 = vmin.xlane.f32.xlu1 %v2011_v16  ;;  %v2009_v17 = vadd.f32 %v3612_v9, %v3621_v14  ;;  %v3632_v19 = vadd.f32 %v2919_v44, %v3609_v8  ;;  %v2129_v21 = vadd.f32 %v3615_v10, %v3621_v14 }
 0x34e   : > { %v2066_v22 = vsub.f32 %v3621_v14, %v3612_v9  ;;  %v1922_v18 = vpop.f32.mrf.mxu0  ;;  %v2186_v26 = vsub.f32 %v3621_v14, %v3615_v10 }
 0x34f   : > { %v2069_v24 = vsub.f32 %v3632_v19, %v3612_v9  ;;  %v3643_v25 = vadd.f32 %v3609_v8, %v1922_v18  ;;  %v2189_v27 = vsub.f32 %v3632_v19, %v3615_v10  ;;  %v2012_v33 = vadd.f32 %v3612_v9, %v3632_v19 }
 0x350   : > { %v2132_v36 = vadd.f32 %v3615_v10, %v3632_v19 }
 0x351   : > { %2089 = vmax.xlane.f32.xlu1 %v2068_v49  ;;  %2028 = vmin.xlane.f32.xlu0 %v2009_v17  ;;  %v2010_v34 = vadd.f32 %v3612_v9, %v3643_v25  ;;  %v2067_v37 = vsub.f32 %v3643_v25, %v3612_v9  ;;  %v2130_v40 = vadd.f32 %v3615_v10, %v3643_v25 }
 0x352   : > { %v2187_v41 = vsub.f32 %v3643_v25, %v3615_v10 }
 0x355   : > { %2209 = vmax.xlane.f32.xlu1 %v2188_v20  ;;  %2148 = vmin.xlane.f32.xlu0 %v2129_v21 }
 0x358   : > { %v2922_v32 = vpop.f32.mrf.mxu1 }
 0x359   : > { %2085 = vmax.xlane.f32.xlu1 %v2066_v22  ;;  %2091 = vmax.xlane.f32.xlu0 %v2069_v24  ;;  %v3658_v39 = vadd.f32 %v2922_v32, %v3609_v8 }
 0x35a   : > { %v1935_v35 = vpop.f32.mrf.mxu1 }
 0x35b   : > { %v2072_v45 = vsub.f32 %v3658_v39, %v3612_v9  ;;  %v2015_v46 = vadd.f32 %v3612_v9, %v3658_v39  ;;  %v3669_v48 = vadd.f32 %v3609_v8, %v1935_v35  ;;  %v2192_v50 = vsub.f32 %v3658_v39, %v3615_v10 }
 0x35c   : > { %v2923_v38 = vpop.f32.mrf.mxu1  ;;  %v2135_v51 = vadd.f32 %v3615_v10, %v3658_v39 }
 0x35d   : > { %2205 = vmax.xlane.f32.xlu1 %v2186_v26  ;;  %2211 = vmax.xlane.f32.xlu0 %v2189_v27  ;;  %v2070_v53 = vsub.f32 %v3669_v48, %v3612_v9  ;;  %v2013_v54 = vadd.f32 %v3612_v9, %v3669_v48  ;;  %v3680_v56 = vadd.f32 %v2923_v38, %v3609_v8 }
 0x35e   : > { %v1938_v42 = vpop.f32.mrf.mxu1  ;;  %v2190_v57 = vsub.f32 %v3669_v48, %v3615_v10  ;;  %v2133_v58 = vadd.f32 %v3615_v10, %v3669_v48 }
 0x35f   : > { %v2016_v61 = vadd.f32 %v3612_v9, %v3680_v56  ;;  %v2073_v62 = vsub.f32 %v3680_v56, %v3612_v9  ;;  %v3695_v30 = vadd.f32 %v3609_v8, %v1938_v42  ;;  %v2136_v0 = vadd.f32 %v3615_v10, %v3680_v56 }
 0x360   : > { %v2193_v1 = vsub.f32 %v3680_v56, %v3615_v10 }
 0x361   : > { %2034 = vmin.xlane.f32.xlu1 %v2012_v33  ;;  %2030 = vmin.xlane.f32.xlu0 %v2010_v34  ;;  %v2014_v2 = vadd.f32 %v3612_v9, %v3695_v30  ;;  %v2071_v28 = vsub.f32 %v3695_v30, %v3612_v9  ;;  %v2134_v7 = vadd.f32 %v3615_v10, %v3695_v30 }
 0x362   : > { %v2191_v11 = vsub.f32 %v3695_v30, %v3615_v10 }
 0x365   : > { %2154 = vmin.xlane.f32.xlu1 %v2132_v36  ;;  %2087 = vmax.xlane.f32.xlu0 %v2067_v37 }
 0x368   : > { %v2926_v43 = vpop.f32.mrf.mxu1 }
 0x369   : > { %2150 = vmin.xlane.f32.xlu1 %v2130_v40  ;;  %2207 = vmax.xlane.f32.xlu0 %v2187_v41  ;;  %v3712_v6 = vadd.f32 %v2926_v43, %v3609_v8 }
 0x36a   : > { %v1951_v47 = vpop.f32.mrf.mxu1 }
 0x36b   : > { %v2076_v15 = vsub.f32 %v3712_v6, %v3612_v9  ;;  %v2019_v16 = vadd.f32 %v3612_v9, %v3712_v6  ;;  %v3723_v49 = vadd.f32 %v3609_v8, %v1951_v47  ;;  %v2196_v17 = vsub.f32 %v3712_v6, %v3615_v10 }
 0x36c   : > { %v2927_v52 = vpop.f32.mrf.mxu1  ;;  %v2139_v44 = vadd.f32 %v3615_v10, %v3712_v6 }
 0x36d   : > { %2097 = vmax.xlane.f32.xlu1 %v2072_v45  ;;  %2040 = vmin.xlane.f32.xlu0 %v2015_v46  ;;  %v2074_v20 = vsub.f32 %v3723_v49, %v3612_v9  ;;  %v2017_v21 = vadd.f32 %v3612_v9, %v3723_v49  ;;  %v3734_v22 = vadd.f32 %v2927_v52, %v3609_v8 }
 0x36e   : > { %v1954_v55 = vpop.f32.mrf.mxu1  ;;  %v2194_v24 = vsub.f32 %v3723_v49, %v3615_v10  ;;  %v2137_v18 = vadd.f32 %v3615_v10, %v3723_v49 }
 0x36f   : > { %v2020_v26 = vadd.f32 %v3612_v9, %v3734_v22  ;;  %v2077_v27 = vsub.f32 %v3734_v22, %v3612_v9  ;;  %v3745_v32 = vadd.f32 %v3609_v8, %v1954_v55  ;;  %v2140_v33 = vadd.f32 %v3615_v10, %v3734_v22 }
 0x370   : > { %v2197_v34 = vsub.f32 %v3734_v22, %v3615_v10 }
 0x371   : > { %2217 = vmax.xlane.f32.xlu1 %v2192_v50  ;;  %2160 = vmin.xlane.f32.xlu0 %v2135_v51  ;;  %v2018_v35 = vadd.f32 %v3612_v9, %v3745_v32  ;;  %v2075_v36 = vsub.f32 %v3745_v32, %v3612_v9  ;;  %v2138_v38 = vadd.f32 %v3615_v10, %v3745_v32 }
 0x372   : > { %v2195_v40 = vsub.f32 %v3745_v32, %v3615_v10 }
 0x375   : > { %2093 = vmax.xlane.f32.xlu1 %v2070_v53  ;;  %2036 = vmin.xlane.f32.xlu0 %v2013_v54 }
 0x378   : > { %v2930_v59 = vpop.f32.mrf.mxu1 }
 0x379   : > { %2213 = vmax.xlane.f32.xlu1 %v2190_v57  ;;  %2156 = vmin.xlane.f32.xlu0 %v2133_v58  ;;  %v3756_v37 = vadd.f32 %v2930_v59, %v3609_v8 }
 0x37a   : > { %v3686_v60 = vpop.f32.mrf.mxu1 }
 0x37b   : > { %v2080_v41 = vsub.f32 %v3756_v37, %v3612_v9  ;;  %v2023_v42 = vadd.f32 %v3612_v9, %v3756_v37  ;;  %v3768_v43 = vadd.f32 %v3609_v8, %v3686_v60  ;;  %v2200_v45 = vsub.f32 %v3756_v37, %v3615_v10 }
 0x37c   : > { %v3692_v63 = vpop.f32.mrf.mxu1  ;;  %v2143_v46 = vadd.f32 %v3615_v10, %v3756_v37 }
 0x37d   : > { %2042 = vmin.xlane.f32.xlu1 %v2016_v61  ;;  %2099 = vmax.xlane.f32.xlu0 %v2073_v62  ;;  %v2078_v47 = vsub.f32 %v3768_v43, %v3612_v9  ;;  %v2021_v50 = vadd.f32 %v3612_v9, %v3768_v43  ;;  %v3780_v51 = vadd.f32 %v3692_v63, %v3609_v8 }
 0x37e   : > { %v3701_v31 = vpop.f32.mrf.mxu1  ;;  %v2198_v52 = vsub.f32 %v3768_v43, %v3615_v10  ;;  %v2141_v53 = vadd.f32 %v3615_v10, %v3768_v43 }
 0x37f   : > { %v2024_v54 = vadd.f32 %v3612_v9, %v3780_v51  ;;  %v2081_v55 = vsub.f32 %v3780_v51, %v3612_v9  ;;  %v3792_v57 = vadd.f32 %v3609_v8, %v3701_v31  ;;  %v2144_v58 = vadd.f32 %v3615_v10, %v3780_v51 }
 0x380   : > { %v2201_v59 = vsub.f32 %v3780_v51, %v3615_v10 }
 0x381   : > { %2162 = vmin.xlane.f32.xlu1 %v2136_v0  ;;  %2219 = vmax.xlane.f32.xlu0 %v2193_v1  ;;  %v2022_v60 = vadd.f32 %v3612_v9, %v3792_v57  ;;  %v2079_v61 = vsub.f32 %v3792_v57, %v3612_v9  ;;  %v2142_v63 = vadd.f32 %v3615_v10, %v3792_v57 }
 0x382   : > { %v2199_v0 = vsub.f32 %v3792_v57, %v3615_v10 }
 0x384   : > { %v3707_v5 = vpop.f32.mrf.mxu1 }
 0x385   : > { %2038 = vmin.xlane.f32.xlu1 %v2014_v2  ;;  %2095 = vmax.xlane.f32.xlu0 %v2071_v28  ;;  %v3804_v62 = vadd.f32 %v3707_v5, %v3609_v8 }
 0x386   : > { %v3709_v4 = vpop.f32.mrf.mxu1 }
 0x387   : > { %v3812_v1 = vadd.f32 %v3609_v8, %v3709_v4  ;;  %v2084_v31 = vsub.f32 %v3804_v62, %v3612_v9  ;;  %v2027_v2 = vadd.f32 %v3612_v9, %v3804_v62  ;;  %v2147_v5 = vadd.f32 %v3615_v10, %v3804_v62 }
 0x388   : > { %v2935_v13 = vpop.f32.mrf.mxu1 }
 0x389   : > { %2158 = vmin.xlane.f32.xlu1 %v2134_v7  ;;  %2215 = vmax.xlane.f32.xlu0 %v2191_v11  ;;  %v2082_v28 = vsub.f32 %v3812_v1, %v3612_v9  ;;  %v2202_v11 = vsub.f32 %v3812_v1, %v3615_v10  ;;  %v2025_v13 = vadd.f32 %v3612_v9, %v3812_v1 }
 0x38a   : > { %v1986_v7 = vpop.f32.mrf.mxu1 }
 0x38b   : > { %v3823_v4 = vadd.f32 %v3609_v8, %v1986_v7  ;;  %v3835_v8 = vrot.slane %v3598_v29, %v3460_v23 }
 0x38d   : > { %2105 = vmax.xlane.f32.xlu1 %v2076_v15  ;;  %2048 = vmin.xlane.f32.xlu0 %v2019_v16 }
 0x391   : > { %2225 = vmax.xlane.f32.xlu1 %v2196_v17  ;;  %2168 = vmin.xlane.f32.xlu0 %v2139_v44  ;;  %v2026_v17 = vadd.f32 %v3612_v9, %v3823_v4  ;;  %v2145_v44 = vadd.f32 %v3615_v10, %v3812_v1 }
 0x395   : > { %2101 = vmax.xlane.f32.xlu1 %v2074_v20  ;;  %2044 = vmin.xlane.f32.xlu0 %v2017_v21  ;;  %v3840_v20 = vrot.slane %v1999_v3, %v3460_v23 }
 0x399   : > { %2221 = vmax.xlane.f32.xlu1 %v2194_v24  ;;  %2164 = vmin.xlane.f32.xlu0 %v2137_v18  ;;  %v2146_v18 = vadd.f32 %v3615_v10, %v3823_v4 }
 0x39d   : > { %2050 = vmin.xlane.f32.xlu1 %v2020_v26  ;;  %2107 = vmax.xlane.f32.xlu0 %v2077_v27  ;;  %v2083_v26 = vsub.f32 %v3823_v4, %v3612_v9 }
 0x3a1   : > { %2170 = vmin.xlane.f32.xlu1 %v2140_v33  ;;  %2227 = vmax.xlane.f32.xlu0 %v2197_v34 }
 0x3a5   : > { %2046 = vmin.xlane.f32.xlu1 %v2018_v35  ;;  %2103 = vmax.xlane.f32.xlu0 %v2075_v36  ;;  %v2204_v35 = vsub.f32 %v3804_v62, %v3615_v10  ;;  %v2203_v36 = vsub.f32 %v3823_v4, %v3615_v10 }
 0x3a9   : > { %2166 = vmin.xlane.f32.xlu1 %v2138_v38  ;;  %2223 = vmax.xlane.f32.xlu0 %v2195_v40 }
 0x3ad   : > { %2113 = vmax.xlane.f32.xlu1 %v2080_v41  ;;  %2056 = vmin.xlane.f32.xlu0 %v2023_v42 }
 0x3b1   : > { %2233 = vmax.xlane.f32.xlu1 %v2200_v45  ;;  %2176 = vmin.xlane.f32.xlu0 %v2143_v46 }
 0x3b5   : > { %2109 = vmax.xlane.f32.xlu1 %v2078_v47  ;;  %2052 = vmin.xlane.f32.xlu0 %v2021_v50 }
 0x3b9   : > { %2229 = vmax.xlane.f32.xlu1 %v2198_v52  ;;  %2172 = vmin.xlane.f32.xlu0 %v2141_v53 }
 0x3bd   : > { %2058 = vmin.xlane.f32.xlu1 %v2024_v54  ;;  %2115 = vmax.xlane.f32.xlu0 %v2081_v55 }
 0x3c1   : > { %2178 = vmin.xlane.f32.xlu1 %v2144_v58  ;;  %2235 = vmax.xlane.f32.xlu0 %v2201_v59 }
 0x3c5   : > { %2054 = vmin.xlane.f32.xlu1 %v2022_v60  ;;  %2111 = vmax.xlane.f32.xlu0 %v2079_v61 }
 0x3c9   : > { %2174 = vmin.xlane.f32.xlu1 %v2142_v63  ;;  %2231 = vmax.xlane.f32.xlu0 %v2199_v0 }
 0x3cd   : > { %2121 = vmax.xlane.f32.xlu1 %v2084_v31  ;;  %2064 = vmin.xlane.f32.xlu0 %v2027_v2 }
 0x3d1   : > { %2117 = vmax.xlane.f32.xlu1 %v2082_v28  ;;  %2184 = vmin.xlane.f32.xlu0 %v2147_v5 }
 0x3d5   : > { %2237 = vmax.xlane.f32.xlu1 %v2202_v11  ;;  %2060 = vmin.xlane.f32.xlu0 %v2025_v13 }
 0x3d6   : > { %v2153_v15 = vpop.xlane.xlu0 %2152  ;;  %v2033_v16 = vpop.xlane.xlu1 %2032 }
 0x3d7   : > { %v2276_v27 = vmul.f32 %v3840_v20, %v2153_v15  ;;  %v2251_v33 = vmul.f32 %v3835_v8, %v2033_v16 }
 0x3d9   : > { %2062 = vmin.xlane.f32.xlu1 %v2026_v17  ;;  %2180 = vmin.xlane.f32.xlu0 %v2145_v44  ;;  %v2295_v38 = vadd.f32 %v2276_v27, %v2251_v33  ;;  %v3870_v27 = vld [vmem:[%s4051_s11] ss:$0 sm:$0xff] }
 0x3da   : > { %v2090_v21 = vpop.xlane.xlu1 %2089  ;;  %v2029_v24 = vpop.xlane.xlu0 %2028 }
 0x3db   : > { %v2314_v23 = vmul.f32 %v3835_v8, %v2090_v21  ;;  %v2249_v52 = vmul.f32 %v3835_v8, %v2029_v24  ;;  %v2428_v13 = vsub.f32 %v3618_v12, %v2295_v38 }
 0x3dd   : > { %2182 = vmin.xlane.f32.xlu1 %v2146_v18  ;;  %2119 = vmax.xlane.f32.xlu0 %v2083_v26 }
 0x3de   : > { %v2210_v34 = vpop.xlane.xlu1 %2209  ;;  %v2149_v29 = vpop.xlane.xlu0 %2148 }
 0x3df   : > { %v2333_v3 = vmul.f32 %v3840_v20, %v2210_v34  ;;  %v2274_v46 = vmul.f32 %v3840_v20, %v2149_v29 }
 0x3e1   : > { %v2352_v9 = vadd.f32 %v2333_v3, %v2314_v23  ;;  %2241 = vmax.xlane.f32.xlu1 %v2204_v35  ;;  %2239 = vmax.xlane.f32.xlu0 %v2203_v36  ;;  %v2293_v10 = vadd.f32 %v2274_v46, %v2249_v52  ;;  %v3876_v23 = vld [vmem:[%s4052_s12] ss:$0 sm:$0xff] }
 0x3e2   : > { %v2086_v40 = vpop.xlane.xlu1 %2085  ;;  %v2092_v41 = vpop.xlane.xlu0 %2091 }
 0x3e3   : > { %v2371_v42 = vsub.f32 %v2352_v9, %v2295_v38  ;;  %v2312_v53 = vmul.f32 %v3835_v8, %v2086_v40  ;;  %v2315_v2 = vmul.f32 %v3835_v8, %v2092_v41  ;;  %v2426_v41 = vsub.f32 %v3621_v14, %v2293_v10 }
 0x3e5   : > { %v2390_v45 = vadd.f32 1e-08, %v2371_v42 }
 0x3e6   : > { %v2206_v47 = vpop.xlane.xlu1 %2205  ;;  %v2212_v50 = vpop.xlane.xlu0 %2211 }
 0x3e7   : > { %3049 = vrcp.f32 %v2390_v45  ;;  %v2331_v54 = vmul.f32 %v3840_v20, %v2206_v47  ;;  %v2334_v63 = vmul.f32 %v3840_v20, %v2212_v50 }
 0x3e9   : > { %v2350_v55 = vadd.f32 %v2331_v54, %v2312_v53  ;;  %v2353_v7 = vadd.f32 %v2334_v63, %v2315_v2 }
 0x3ea   : > { %v2035_v58 = vpop.xlane.xlu1 %2034  ;;  %v2031_v59 = vpop.xlane.xlu0 %2030 }
 0x3eb   : > { %v2369_v60 = vsub.f32 %v2350_v55, %v2293_v10  ;;  %v2252_v28 = vmul.f32 %v3835_v8, %v2035_v58  ;;  %v2250_v15 = vmul.f32 %v3835_v8, %v2031_v59 }
 0x3ed   : > { %v2388_v61 = vadd.f32 1e-08, %v2369_v60 }
 0x3ee   : > { %v2155_v0 = vpop.xlane.xlu1 %2154  ;;  %v2088_v31 = vpop.xlane.xlu0 %2087 }
 0x3ef   : > { %3051 = vrcp.f32 %v2388_v61  ;;  %v2277_v5 = vmul.f32 %v3840_v20, %v2155_v0  ;;  %v2313_v21 = vmul.f32 %v3835_v8, %v2088_v31 }
 0x3f1   : > { %v2296_v11 = vadd.f32 %v2277_v5, %v2252_v28 }
 0x3f2   : > { %v2151_v16 = vpop.xlane.xlu1 %2150  ;;  %v2208_v17 = vpop.xlane.xlu0 %2207 }
 0x3f3   : > { %v2372_v44 = vsub.f32 %v2353_v7, %v2296_v11  ;;  %v2275_v24 = vmul.f32 %v3840_v20, %v2151_v16  ;;  %v2332_v18 = vmul.f32 %v3840_v20, %v2208_v17  ;;  %v2429_v0 = vsub.f32 %v3632_v19, %v2296_v11 }
 0x3f4   : > { %v3050_v26 = vpop.eup %3049 }
 0x3f5   : > { %v2447_v33 = vmul.f32 %v3050_v26, %v2428_v13  ;;  %v2391_v12 = vadd.f32 1e-08, %v2372_v44  ;;  %v2294_v34 = vadd.f32 %v2275_v24, %v2250_v15  ;;  %v2351_v29 = vadd.f32 %v2332_v18, %v2313_v21 }
 0x3f6   : > { %v2098_v3 = vpop.xlane.xlu1 %2097  ;;  %v2041_v35 = vpop.xlane.xlu0 %2040 }
 0x3f7   : > { %v2473_v36 = vmul.f32 %v3870_v27, %v2447_v33  ;;  %3053 = vrcp.f32 %v2391_v12  ;;  %v2370_v38 = vsub.f32 %v2351_v29, %v2294_v34  ;;  %v2318_v42 = vmul.f32 %v3835_v8, %v2098_v3 }
 0x3f8   : > { %v2255_v47 = vmul.f32 %v3835_v8, %v2041_v35  ;;  %v2427_v24 = vsub.f32 %v3643_v25, %v2294_v34 }
 0x3f9   : > { %v2499_v9 = vadd.f32 %v3876_v23, %v2473_v36  ;;  %v2389_v40 = vadd.f32 1e-08, %v2370_v38 }
 0x3fa   : > { %v2218_v45 = vpop.xlane.xlu1 %2217  ;;  %v2161_v46 = vpop.xlane.xlu0 %2160 }
 0x3fb   : > { %2519 = vst.msk [vmem:[%s3882_s28 + $0x10] sm:$0xff] %vm2516_vm2, %v2499_v9  ;;  %3055 = vrcp.f32 %v2389_v40  ;;  %v2337_v50 = vmul.f32 %v3840_v20, %v2218_v45  ;;  %v2280_v52 = vmul.f32 %v3840_v20, %v2161_v46 }
 0x3fc   : > { %v3052_v53 = vpop.eup %3051 }
 0x3fd   : > { %v2445_v54 = vmul.f32 %v3052_v53, %v2426_v41  ;;  %v2356_v55 = vadd.f32 %v2337_v50, %v2318_v42  ;;  %v2299_v58 = vadd.f32 %v2280_v52, %v2255_v47 }
 0x3fe   : > { %v2094_v59 = vpop.xlane.xlu1 %2093  ;;  %v2037_v14 = vpop.xlane.xlu0 %2036 }
 0x3ff   : > { %v2471_v10 = vmul.f32 %v3870_v27, %v2445_v54  ;;  %v2375_v60 = vsub.f32 %v2356_v55, %v2299_v58  ;;  %v2316_v31 = vmul.f32 %v3835_v8, %v2094_v59  ;;  %v2253_v5 = vmul.f32 %v3835_v8, %v2037_v14 }
 0x400   : > { %v2432_v47 = vsub.f32 %v3658_v39, %v2299_v58 }
 0x401   : > { %v2497_v61 = vadd.f32 %v3876_v23, %v2471_v10  ;;  %v2394_v63 = vadd.f32 1e-08, %v2375_v60 }
 0x402   : > { %v2214_v2 = vpop.xlane.xlu1 %2213  ;;  %v2157_v28 = vpop.xlane.xlu0 %2156 }
 0x403   : > { %2517 = vst.msk [vmem:[%s3882_s28] sm:$0xff] %vm2516_vm2, %v2497_v61  ;;  %3057 = vrcp.f32 %v2394_v63  ;;  %v2335_v7 = vmul.f32 %v3840_v20, %v2214_v2  ;;  %v2278_v13 = vmul.f32 %v3840_v20, %v2157_v28 }
 0x404   : > { %v3054_v15 = vpop.eup %3053 }
 0x405   : > { %v2448_v16 = vmul.f32 %v3054_v15, %v2429_v0  ;;  %v2354_v17 = vadd.f32 %v2335_v7, %v2316_v31  ;;  %v2297_v44 = vadd.f32 %v2278_v13, %v2253_v5 }
 0x406   : > { %v2043_v21 = vpop.xlane.xlu1 %2042  ;;  %v2100_v19 = vpop.xlane.xlu0 %2099 }
 0x407   : > { %v2474_v11 = vmul.f32 %v3870_v27, %v2448_v16  ;;  %v2373_v18 = vsub.f32 %v2354_v17, %v2297_v44  ;;  %v2256_v3 = vmul.f32 %v3835_v8, %v2043_v21  ;;  %v2319_v35 = vmul.f32 %v3835_v8, %v2100_v19 }
 0x408   : > { %v3056_v26 = vpop.eup %3055  ;;  %v2430_v28 = vsub.f32 %v3669_v48, %v2297_v44 }
 0x409   : > { %v2500_v33 = vadd.f32 %v3876_v23, %v2474_v11  ;;  %v2446_v12 = vmul.f32 %v3056_v26, %v2427_v24  ;;  %v2392_v29 = vadd.f32 1e-08, %v2373_v18 }
 0x40a   : > { %v2163_v36 = vpop.xlane.xlu1 %2162  ;;  %v2220_v38 = vpop.xlane.xlu0 %2219 }
 0x40b   : > { %2520 = vst.msk [vmem:[%s3882_s28 + $0x18] sm:$0xff] %vm2516_vm2, %v2500_v33  ;;  %v2472_v9 = vmul.f32 %v3870_v27, %v2446_v12  ;;  %3059 = vrcp.f32 %v2392_v29  ;;  %v2281_v25 = vmul.f32 %v3840_v20, %v2163_v36  ;;  %v2338_v34 = vmul.f32 %v3840_v20, %v2220_v38 }
 0x40d   : > { %v2498_v40 = vadd.f32 %v3876_v23, %v2472_v9  ;;  %v2300_v41 = vadd.f32 %v2281_v25, %v2256_v3  ;;  %v2357_v42 = vadd.f32 %v2338_v34, %v2319_v35 }
 0x40e   : > { %v2039_v45 = vpop.xlane.xlu1 %2038  ;;  %v2096_v46 = vpop.xlane.xlu0 %2095 }
 0x40f   : > { %2518 = vst.msk [vmem:[%s3882_s28 + $0x8] sm:$0xff] %vm2516_vm2, %v2498_v40  ;;  %v2376_v50 = vsub.f32 %v2357_v42, %v2300_v41  ;;  %v2254_v55 = vmul.f32 %v3835_v8, %v2039_v45  ;;  %v2317_v59 = vmul.f32 %v3835_v8, %v2096_v46  ;;  %v2433_v29 = vsub.f32 %v3680_v56, %v2300_v41 }
 0x410   : > { %v3058_v52 = vpop.eup %3057 }
 0x411   : > { %v2451_v53 = vmul.f32 %v3058_v52, %v2432_v47  ;;  %v2395_v54 = vadd.f32 1e-08, %v2376_v50 }
 0x412   : > { %v2159_v14 = vpop.xlane.xlu1 %2158  ;;  %v2216_v10 = vpop.xlane.xlu0 %2215 }
 0x413   : > { %v2477_v60 = vmul.f32 %v3870_v27, %v2451_v53  ;;  %3061 = vrcp.f32 %v2395_v54  ;;  %v2279_v61 = vmul.f32 %v3840_v20, %v2159_v14  ;;  %v2336_v63 = vmul.f32 %v3840_v20, %v2216_v10 }
 0x415   : > { %v2503_v39 = vadd.f32 %v3876_v23, %v2477_v60  ;;  %v2298_v58 = vadd.f32 %v2279_v61, %v2254_v55  ;;  %v2355_v0 = vadd.f32 %v2336_v63, %v2317_v59 }
 0x416   : > { %v2106_v31 = vpop.xlane.xlu1 %2105  ;;  %v2049_v2 = vpop.xlane.xlu0 %2048 }
 0x417   : > { %2523 = vst.msk [vmem:[%s3882_s28 + $0x30] sm:$0xff] %vm2516_vm2, %v2503_v39  ;;  %v2374_v5 = vsub.f32 %v2355_v0, %v2298_v58  ;;  %v2322_v16 = vmul.f32 %v3835_v8, %v2106_v31  ;;  %v2259_v17 = vmul.f32 %v3835_v8, %v2049_v2  ;;  %v2431_v53 = vsub.f32 %v3695_v30, %v2298_v58 }
 0x418   : > { %v3060_v7 = vpop.eup %3059 }
 0x419   : > { %v2449_v13 = vmul.f32 %v3060_v7, %v2430_v28  ;;  %v2393_v15 = vadd.f32 1e-08, %v2374_v5 }
 0x41a   : > { %v2226_v21 = vpop.xlane.xlu1 %2225  ;;  %v2169_v19 = vpop.xlane.xlu0 %2168 }
 0x41b   : > { %v2475_v11 = vmul.f32 %v3870_v27, %v2449_v13  ;;  %3063 = vrcp.f32 %v2393_v15  ;;  %v2341_v24 = vmul.f32 %v3840_v20, %v2226_v21  ;;  %v2284_v18 = vmul.f32 %v3840_v20, %v2169_v19 }
 0x41d   : > { %v2501_v48 = vadd.f32 %v3876_v23, %v2475_v11  ;;  %v2360_v44 = vadd.f32 %v2341_v24, %v2322_v16  ;;  %v2303_v26 = vadd.f32 %v2284_v18, %v2259_v17 }
 0x41e   : > { %v2102_v33 = vpop.xlane.xlu1 %2101  ;;  %v2045_v12 = vpop.xlane.xlu0 %2044 }
 0x41f   : > { %2521 = vst.msk [vmem:[%s3882_s28 + $0x20] sm:$0xff] %vm2516_vm2, %v2501_v48  ;;  %v2379_v3 = vsub.f32 %v2360_v44, %v2303_v26  ;;  %v2320_v9 = vmul.f32 %v3835_v8, %v2102_v33  ;;  %v2257_v25 = vmul.f32 %v3835_v8, %v2045_v12  ;;  %v2436_v7 = vsub.f32 %v3712_v6, %v2303_v26 }
 0x420   : > { %v3062_v35 = vpop.eup %3061 }
 0x421   : > { %v2452_v36 = vmul.f32 %v3062_v35, %v2433_v29  ;;  %v2398_v38 = vadd.f32 1e-08, %v2379_v3 }
 0x422   : > { %v2222_v34 = vpop.xlane.xlu1 %2221  ;;  %v2165_v40 = vpop.xlane.xlu0 %2164 }
 0x423   : > { %v2478_v42 = vmul.f32 %v3870_v27, %v2452_v36  ;;  %3065 = vrcp.f32 %v2398_v38  ;;  %v2339_v45 = vmul.f32 %v3840_v20, %v2222_v34  ;;  %v2282_v46 = vmul.f32 %v3840_v20, %v2165_v40 }
 0x425   : > { %v2504_v56 = vadd.f32 %v3876_v23, %v2478_v42  ;;  %v2358_v41 = vadd.f32 %v2339_v45, %v2320_v9  ;;  %v2301_v47 = vadd.f32 %v2282_v46, %v2257_v25 }
 0x426   : > { %v2051_v50 = vpop.xlane.xlu1 %2050  ;;  %v2108_v52 = vpop.xlane.xlu0 %2107 }
 0x427   : > { %2524 = vst.msk [vmem:[%s3882_s28 + $0x38] sm:$0xff] %vm2516_vm2, %v2504_v56  ;;  %v2377_v54 = vsub.f32 %v2358_v41, %v2301_v47  ;;  %v2260_v10 = vmul.f32 %v3835_v8, %v2051_v50  ;;  %v2323_v60 = vmul.f32 %v3835_v8, %v2108_v52  ;;  %v2434_v3 = vsub.f32 %v3723_v49, %v2301_v47 }
 0x428   : > { %v3064_v55 = vpop.eup %3063 }
 0x429   : > { %v2450_v59 = vmul.f32 %v3064_v55, %v2431_v53  ;;  %v2396_v14 = vadd.f32 1e-08, %v2377_v54 }
 0x42a   : > { %v2171_v61 = vpop.xlane.xlu1 %2170  ;;  %v2228_v63 = vpop.xlane.xlu0 %2227 }
 0x42b   : > { %v2476_v39 = vmul.f32 %v3870_v27, %v2450_v59  ;;  %3067 = vrcp.f32 %v2396_v14  ;;  %v2285_v0 = vmul.f32 %v3840_v20, %v2171_v61  ;;  %v2342_v31 = vmul.f32 %v3840_v20, %v2228_v63 }
 0x42d   : > { %v2502_v30 = vadd.f32 %v3876_v23, %v2476_v39  ;;  %v2304_v58 = vadd.f32 %v2285_v0, %v2260_v10  ;;  %v2361_v2 = vadd.f32 %v2342_v31, %v2323_v60 }
 0x42e   : > { %v2047_v28 = vpop.xlane.xlu1 %2046  ;;  %v2104_v5 = vpop.xlane.xlu0 %2103 }
 0x42f   : > { %2522 = vst.msk [vmem:[%s3882_s28 + $0x28] sm:$0xff] %vm2516_vm2, %v2502_v30  ;;  %v2380_v13 = vsub.f32 %v2361_v2, %v2304_v58  ;;  %v2258_v21 = vmul.f32 %v3835_v8, %v2047_v28  ;;  %v2321_v19 = vmul.f32 %v3835_v8, %v2104_v5  ;;  %v2437_v53 = vsub.f32 %v3734_v22, %v2304_v58 }
 0x430   : > { %v3066_v15 = vpop.eup %3065 }
 0x431   : > { %v2455_v16 = vmul.f32 %v3066_v15, %v2436_v7  ;;  %v2399_v17 = vadd.f32 1e-08, %v2380_v13 }
 0x432   : > { %v2167_v11 = vpop.xlane.xlu1 %2166  ;;  %v2224_v24 = vpop.xlane.xlu0 %2223 }
 0x433   : > { %v2481_v18 = vmul.f32 %v3870_v27, %v2455_v16  ;;  %3069 = vrcp.f32 %v2399_v17  ;;  %v2283_v48 = vmul.f32 %v3840_v20, %v2167_v11  ;;  %v2340_v44 = vmul.f32 %v3840_v20, %v2224_v24 }
 0x435   : > { %v2507_v6 = vadd.f32 %v3876_v23, %v2481_v18  ;;  %v2302_v26 = vadd.f32 %v2283_v48, %v2258_v21  ;;  %v2359_v33 = vadd.f32 %v2340_v44, %v2321_v19 }
 0x436   : > { %v2114_v12 = vpop.xlane.xlu1 %2113  ;;  %v2057_v29 = vpop.xlane.xlu0 %2056 }
 0x437   : > { %2527 = vst.msk [vmem:[%s3882_s28 + $0x50] sm:$0xff] %vm2516_vm2, %v2507_v6  ;;  %v2378_v35 = vsub.f32 %v2359_v33, %v2302_v26  ;;  %v2326_v25 = vmul.f32 %v3835_v8, %v2114_v12  ;;  %v2263_v34 = vmul.f32 %v3835_v8, %v2057_v29  ;;  %v2435_v5 = vsub.f32 %v3745_v32, %v2302_v26 }
 0x438   : > { %v3068_v36 = vpop.eup %3067 }
 0x439   : > { %v2453_v38 = vmul.f32 %v3068_v36, %v2434_v3  ;;  %v2397_v9 = vadd.f32 1e-08, %v2378_v35 }
 0x43a   : > { %v2234_v40 = vpop.xlane.xlu1 %2233  ;;  %v2177_v42 = vpop.xlane.xlu0 %2176 }
 0x43b   : > { %v2479_v45 = vmul.f32 %v3870_v27, %v2453_v38  ;;  %3071 = vrcp.f32 %v2397_v9  ;;  %v2345_v46 = vmul.f32 %v3840_v20, %v2234_v40  ;;  %v2288_v56 = vmul.f32 %v3840_v20, %v2177_v42 }
 0x43d   : > { %v2505_v49 = vadd.f32 %v3876_v23, %v2479_v45  ;;  %v2364_v41 = vadd.f32 %v2345_v46, %v2326_v25  ;;  %v2307_v47 = vadd.f32 %v2288_v56, %v2263_v34 }
 0x43e   : > { %v2110_v50 = vpop.xlane.xlu1 %2109  ;;  %v2053_v52 = vpop.xlane.xlu0 %2052 }
 0x43f   : > { %2525 = vst.msk [vmem:[%s3882_s28 + $0x40] sm:$0xff] %vm2516_vm2, %v2505_v49  ;;  %v2383_v54 = vsub.f32 %v2364_v41, %v2307_v47  ;;  %v2324_v10 = vmul.f32 %v3835_v8, %v2110_v50  ;;  %v2261_v60 = vmul.f32 %v3835_v8, %v2053_v52  ;;  %v2440_v12 = vsub.f32 %v3756_v37, %v2307_v47 }
 0x440   : > { %v3070_v55 = vpop.eup %3069 }
 0x441   : > { %v2456_v59 = vmul.f32 %v3070_v55, %v2437_v53  ;;  %v2402_v14 = vadd.f32 1e-08, %v2383_v54 }
 0x442   : > { %v2230_v61 = vpop.xlane.xlu1 %2229  ;;  %v2173_v63 = vpop.xlane.xlu0 %2172 }
 0x443   : > { %v2482_v39 = vmul.f32 %v3870_v27, %v2456_v59  ;;  %3073 = vrcp.f32 %v2402_v14  ;;  %v2343_v0 = vmul.f32 %v3840_v20, %v2230_v61  ;;  %v2286_v31 = vmul.f32 %v3840_v20, %v2173_v63 }
 0x445   : > { %v2508_v22 = vadd.f32 %v3876_v23, %v2482_v39  ;;  %v2362_v30 = vadd.f32 %v2343_v0, %v2324_v10  ;;  %v2305_v58 = vadd.f32 %v2286_v31, %v2261_v60 }
 0x446   : > { %v2059_v2 = vpop.xlane.xlu1 %2058  ;;  %v2116_v28 = vpop.xlane.xlu0 %2115 }
 0x447   : > { %2528 = vst.msk [vmem:[%s3882_s28 + $0x58] sm:$0xff] %vm2516_vm2, %v2508_v22  ;;  %v2381_v7 = vsub.f32 %v2362_v30, %v2305_v58  ;;  %v2264_v17 = vmul.f32 %v3835_v8, %v2059_v2  ;;  %v2327_v21 = vmul.f32 %v3835_v8, %v2116_v28  ;;  %v2438_v47 = vsub.f32 %v3768_v43, %v2305_v58 }
 0x448   : > { %v3072_v13 = vpop.eup %3071 }
 0x449   : > { %v2454_v15 = vmul.f32 %v3072_v13, %v2435_v5  ;;  %v2400_v16 = vadd.f32 1e-08, %v2381_v7 }
 0x44a   : > { %v2179_v19 = vpop.xlane.xlu1 %2178  ;;  %v2236_v11 = vpop.xlane.xlu0 %2235 }
 0x44b   : > { %v2480_v24 = vmul.f32 %v3870_v27, %v2454_v15  ;;  %3075 = vrcp.f32 %v2400_v16  ;;  %v2289_v18 = vmul.f32 %v3840_v20, %v2179_v19  ;;  %v2346_v48 = vmul.f32 %v3840_v20, %v2236_v11 }
 0x44d   : > { %v2506_v32 = vadd.f32 %v3876_v23, %v2480_v24  ;;  %v2308_v44 = vadd.f32 %v2289_v18, %v2264_v17  ;;  %v2365_v6 = vadd.f32 %v2346_v48, %v2327_v21 }
 0x44e   : > { %v2055_v26 = vpop.xlane.xlu1 %2054  ;;  %v2112_v33 = vpop.xlane.xlu0 %2111 }
 0x44f   : > { %2526 = vst.msk [vmem:[%s3882_s28 + $0x48] sm:$0xff] %vm2516_vm2, %v2506_v32  ;;  %v2384_v29 = vsub.f32 %v2365_v6, %v2308_v44  ;;  %v2262_v38 = vmul.f32 %v3835_v8, %v2055_v26  ;;  %v2325_v9 = vmul.f32 %v3835_v8, %v2112_v33  ;;  %v2441_v63 = vsub.f32 %v3780_v51, %v2308_v44 }
 0x450   : > { %v3074_v3 = vpop.eup %3073 }
 0x451   : > { %v2459_v35 = vmul.f32 %v3074_v3, %v2440_v12  ;;  %v2403_v36 = vadd.f32 1e-08, %v2384_v29 }
 0x452   : > { %v2175_v25 = vpop.xlane.xlu1 %2174  ;;  %v2232_v34 = vpop.xlane.xlu0 %2231 }
 0x453   : > { %v2485_v40 = vmul.f32 %v3870_v27, %v2459_v35  ;;  %3077 = vrcp.f32 %v2403_v36  ;;  %v2287_v42 = vmul.f32 %v3840_v20, %v2175_v25  ;;  %v2344_v45 = vmul.f32 %v3840_v20, %v2232_v34 }
 0x455   : > { %v2511_v37 = vadd.f32 %v3876_v23, %v2485_v40  ;;  %v2306_v46 = vadd.f32 %v2287_v42, %v2262_v38  ;;  %v2363_v56 = vadd.f32 %v2344_v45, %v2325_v9 }
 0x456   : > { %v2122_v49 = vpop.xlane.xlu1 %2121  ;;  %v2065_v41 = vpop.xlane.xlu0 %2064 }
 0x457   : > { %2531 = vst.msk [vmem:[%s3882_s28 + $0x70] sm:$0xff] %vm2516_vm2, %v2511_v37  ;;  %v2382_v50 = vsub.f32 %v2363_v56, %v2306_v46  ;;  %v2439_v16 = vsub.f32 %v3792_v57, %v2306_v46  ;;  %v2330_v18 = vmul.f32 %v3835_v8, %v2122_v49  ;;  %v2267_v26 = vmul.f32 %v3835_v8, %v2065_v41 }
 0x458   : > { %v3076_v52 = vpop.eup %3075 }
 0x459   : > { %v2457_v53 = vmul.f32 %v3076_v52, %v2438_v47  ;;  %v2401_v54 = vadd.f32 1e-08, %v2382_v50 }
 0x45a   : > { %v2118_v55 = vpop.xlane.xlu1 %2117  ;;  %v2185_v59 = vpop.xlane.xlu0 %2184 }
 0x45b   : > { %v2483_v14 = vmul.f32 %v3870_v27, %v2457_v53  ;;  %3079 = vrcp.f32 %v2401_v54  ;;  %v2328_v58 = vmul.f32 %v3835_v8, %v2118_v55  ;;  %v2292_v11 = vmul.f32 %v3840_v20, %v2185_v59 }
 0x45d   : > { %v2509_v10 = vadd.f32 %v3876_v23, %v2483_v14  ;;  %v2311_v35 = vadd.f32 %v2292_v11, %v2267_v26 }
 0x45e   : > { %v2238_v60 = vpop.xlane.xlu1 %2237  ;;  %v2061_v61 = vpop.xlane.xlu0 %2060 }
 0x45f   : > { %2529 = vst.msk [vmem:[%s3882_s28 + $0x60] sm:$0xff] %vm2516_vm2, %v2509_v10  ;;  %v2347_v0 = vmul.f32 %v3840_v20, %v2238_v60  ;;  %v2265_v2 = vmul.f32 %v3835_v8, %v2061_v61  ;;  %v2444_v56 = vsub.f32 %v3804_v62, %v2311_v35 }
 0x460   : > { %v3078_v39 = vpop.eup %3077 }
 0x461   : > { %v2460_v43 = vmul.f32 %v3078_v39, %v2441_v63  ;;  %v2366_v7 = vadd.f32 %v2347_v0, %v2328_v58 }
 0x462   : > { %v2063_v31 = vpop.xlane.xlu1 %2062  ;;  %v2181_v22 = vpop.xlane.xlu0 %2180 }
 0x463   : > { %v2486_v30 = vmul.f32 %v3870_v27, %v2460_v43  ;;  %v2290_v28 = vmul.f32 %v3840_v20, %v2181_v22  ;;  %v2266_v33 = vmul.f32 %v3835_v8, %v2063_v31 }
 0x465   : > { %v2512_v5 = vadd.f32 %v3876_v23, %v2486_v30  ;;  %v2309_v13 = vadd.f32 %v2290_v28, %v2265_v2 }
 0x466   : > { %v2183_v15 = vpop.xlane.xlu1 %2182  ;;  %v2120_v51 = vpop.xlane.xlu0 %2119 }
 0x467   : > { %2532 = vst.msk [vmem:[%s3882_s28 + $0x78] sm:$0xff] %vm2516_vm2, %v2512_v5  ;;  %v2385_v17 = vsub.f32 %v2366_v7, %v2309_v13  ;;  %v2291_v48 = vmul.f32 %v3840_v20, %v2183_v15  ;;  %v2329_v12 = vmul.f32 %v3835_v8, %v2120_v51  ;;  %v2442_v45 = vsub.f32 %v3812_v1, %v2309_v13 }
 0x468   : > { %v3080_v21 = vpop.eup %3079 }
 0x469   : > { %v2458_v19 = vmul.f32 %v3080_v21, %v2439_v16  ;;  %v2404_v24 = vadd.f32 1e-08, %v2385_v17  ;;  %v2310_v38 = vadd.f32 %v2291_v48, %v2266_v33 }
 0x46a   : > { %v2242_v32 = vpop.xlane.xlu1 %2241  ;;  %v2240_v44 = vpop.xlane.xlu0 %2239 }
 0x46b   : > { %v2484_v6 = vmul.f32 %v3870_v27, %v2458_v19  ;;  %3081 = vrcp.f32 %v2404_v24  ;;  %v2349_v57 = vmul.f32 %v3840_v20, %v2242_v32  ;;  %v2348_v29 = vmul.f32 %v3840_v20, %v2240_v44 }
 0x46c   : > { %v2443_v41 = vsub.f32 %v3823_v4, %v2310_v38 }
 0x46d   : > { %v2510_v3 = vadd.f32 %v3876_v23, %v2484_v6  ;;  %v2368_v36 = vadd.f32 %v2349_v57, %v2330_v18  ;;  %v2367_v9 = vadd.f32 %v2348_v29, %v2329_v12 }
 0x46f   : > { %2530 = vst.msk [vmem:[%s3882_s28 + $0x68] sm:$0xff] %vm2516_vm2, %v2510_v3  ;;  %v2387_v25 = vsub.f32 %v2368_v36, %v2311_v35  ;;  %v2386_v34 = vsub.f32 %v2367_v9, %v2310_v38 }
 0x471   : > { %v2406_v40 = vadd.f32 1e-08, %v2387_v25  ;;  %v2405_v42 = vadd.f32 1e-08, %v2386_v34 }
 0x473   : > { %3083 = vrcp.f32 %v2406_v40 }
 0x474   : > { %3085 = vrcp.f32 %v2405_v42 }
 0x478   : > { %v3082_v8 = vpop.eup %3081 }
 0x479   : > { %v2461_v20 = vmul.f32 %v3082_v8, %v2442_v45 }
 0x47b   : > { %v2487_v37 = vmul.f32 %v3870_v27, %v2461_v20 }
 0x47d   : > { %v2513_v46 = vadd.f32 %v3876_v23, %v2487_v37 }
 0x47f   : > { %2533 = vst.msk [vmem:[%s3882_s28 + $0x80] sm:$0xff] %vm2516_vm2, %v2513_v46 }
 0x480   : > { %v3084_v49 = vpop.eup %3083 }
 0x481   : > { %v3086_v47 = vpop.eup %3085  ;;  %v2463_v50 = vmul.f32 %v3084_v49, %v2444_v56 }
 0x482   : > { %v2462_v52 = vmul.f32 %v3086_v47, %v2443_v41 }
 0x483   : > { %v2489_v1 = vmul.f32 %v3870_v27, %v2463_v50 }
 0x484   : > { %v2488_v53 = vmul.f32 %v3870_v27, %v2462_v52 }
 0x485   : > { %v2515_v54 = vadd.f32 %v3876_v23, %v2489_v1 }
 0x486   : > { %v2514_v55 = vadd.f32 %v3876_v23, %v2488_v53 }
 0x487   : > { %2535 = vst.msk [vmem:[%s3882_s28 + $0x90] sm:$0xff] %vm2516_vm2, %v2515_v54 }
 0x488   : > { %2534 = vst.msk [vmem:[%s3882_s28 + $0x88] sm:$0xff] %vm2516_vm2, %v2514_v55 }
 0x489 PF: > { %s23_s25 = sadd.s32 1, %s3093_s25  }
 0x48a   : > { %p20_p4 = scmp.ge.s32.totalorder %s23_s25, 4  }
 0x48c   :  { %22 = sbr.rel (!%p20_p4) target bundleno = 1 (0x1), region = 102 }

</bundles_post_ra>
